<compile_context>
chip_gen: v7x
topology: tpu7x:2x2x1
jax: 0.10.0
libtpu: 0.0.40
codegen_flags: <defaults>
</compile_context>

<pallas_src>
import jax
import jax.numpy as jnp
from jax.experimental import pallas as pl
from jax.experimental.pallas import tpu as pltpu


def _round_up(v, m):
    return (v + m - 1) // m * m


def _mlp_kernel(xt_ref, l1_ref, w2_ref, fin_ref, b3_ref, o_ref, acc_ref):
    """One (batch-tile i, contraction-tile k) grid step; batch on lanes.

    xt_ref  : (1, tn)   f32       x^T tile (batch on lanes)
    l1_ref  : (tk, 2)   f32       [w1 | b1] rows for this k-tile
    w2_ref  : (Hp, tk)  f32/bf16  column slab of w2
    fin_ref : (Hp, 2)   f32       [b2 | w3] (used only at finalize)
    b3_ref  : (1, 1)    f32       SMEM scalar
    o_ref   : (1, tn)   f32       output tile (written on last k step)
    acc_ref : (Hp, tn)  f32       VMEM accumulator scratch
    """
    k = pl.program_id(1)
    nk = pl.num_programs(1)

    x_row = xt_ref[...]                                   # (1, tn)
    l1 = l1_ref[...]                                      # (tk, 2)
    w1c = l1[:, 0:1]                                      # (tk, 1)
    b1c = l1[:, 1:2]                                      # (tk, 1)
    # Layer 1 (this k-slice): K=1 outer product -> pure VPU broadcast, no MXU.
    z1 = jnp.maximum(w1c * x_row + b1c, 0.0)              # (tk, tn) f32

    @pl.when(k == 0)
    def _():
        acc_ref[...] = jnp.zeros_like(acc_ref)

    # Layer 2 partial matmul (the only real MXU work); operands in w2's dtype
    # (bf16 for large H), accumulation always f32.
    acc_ref[...] += jnp.dot(w2_ref[...], z1.astype(w2_ref.dtype),
                            preferred_element_type=jnp.float32)

    @pl.when(k == nk - 1)
    def _():
        fin = fin_ref[...]                                # (Hp, 2)
        b2c = fin[:, 0:1]
        w3c = fin[:, 1:2]
        z2 = jnp.maximum(acc_ref[...] + b2c, 0.0)         # (Hp, tn)
        # Layer 3: VPU multiply + sublane reduce keeps the (1, tn) store
        # lane-dense/unmasked.  (MXU alternative: jnp.dot(w3_row, z2).)
        z3 = jnp.sum(z2 * w3c, axis=0, keepdims=True) + b3_ref[0, 0]
        o_ref[...] = z3.astype(o_ref.dtype)               # (1, tn)


def prepare_learner_params(params, *, mxu_dtype=None):
    """Pad / transpose / pack parameters ONCE (hoisted out of the hot path)."""
    H = int(params["w1"].shape[0])
    hp = _round_up(H, 128)
    if mxu_dtype is None:
        # bf16 on the MXU once the matmul is big enough to matter; small H
        # stays f32 so the forward matches the f32 reference tightly.
        mxu_dtype = jnp.bfloat16 if hp >= 512 else jnp.float32
    f32 = jnp.float32

    l1cols = jnp.zeros((hp, 2), f32)
    l1cols = l1cols.at[:H, 0].set(params["w1"][:, 0].astype(f32))
    l1cols = l1cols.at[:H, 1].set(params["b1"][0, :].astype(f32))

    w2 = jnp.zeros((hp, hp), mxu_dtype).at[:H, :H].set(
        params["w2"].astype(mxu_dtype))

    fincols = jnp.zeros((hp, 2), f32)
    fincols = fincols.at[:H, 0].set(params["b2"][0, :].astype(f32))
    fincols = fincols.at[:H, 1].set(params["w3"][0, :].astype(f32))

    b3 = params["b3"].reshape(1, 1).astype(f32)
    return {"l1cols": l1cols, "w2": w2, "fincols": fincols, "b3": b3,
            "H": H, "hp": hp}


def _pick_tn(N, hp):
    # Larger lane tiles when Hp is small (step-overhead bound); >=2 batch
    # tiles whenever N > 128 so both v7x TensorCores are fed.
    if hp <= 256:
        cap = 2048
    elif hp <= 1024:
        cap = 1024
    else:
        cap = 512
    half = _round_up(max(1, (N + 1) // 2), 128)
    return max(128, min(cap, half))


def _pick_tk(hp):
    for cand in (512, 384, 256, 128):
        if cand <= hp and hp % cand == 0:
            return cand
    return hp


def learner_forward_prepared(x, prep, *, tn=None, tk=None):
    """x: (N, 1) float32; prep: output of prepare_learner_params."""
    N = int(x.shape[0])
    hp = prep["hp"]
    f32 = jnp.float32

    if tn is None:
        tn = _pick_tn(N, hp)
    if tk is None:
        tk = _pick_tk(hp)
    assert hp % tk == 0 and tk % 128 == 0
    n_pad = _round_up(N, tn)
    nt = n_pad // tn
    kt = hp // tk

    xt = jnp.zeros((1, n_pad), f32).at[0, :N].set(x[:, 0].astype(f32))

    # Explicit VMEM budget with headroom, clamped to [32 MiB, 64 MiB]
    # (<= physical on v5e/v6e/v7x, >= every default scoped limit).
    w2_itemsize = jnp.dtype(prep["w2"].dtype).itemsize
    w2_bufs = 2 if kt > 1 else 1
    vmem_need = (
        2 * 8 * tn * 4                       # x^T blocks (1,tn) -> (8,tn)
        + 2 * tk * 128 * 4                   # l1cols blocks (lane-padded)
        + w2_bufs * hp * tk * w2_itemsize    # w2 slabs
        + hp * 128 * 4                       # fincols (single-buffered)
        + 2 * 8 * tn * 4                     # output blocks
        + hp * tn * 4                        # accumulator scratch
        + (hp + tk) * tn * 4                 # z1 / z2 temporaries
    )
    vmem_limit = int(min(64 << 20, max(32 << 20, int(vmem_need * 1.5))))

    def call(single_buffer_invariant):
        def rep(shape):
            if single_buffer_invariant:
                return pl.BlockSpec(shape, lambda i, k: (0, 0),
                                    pipeline_mode=pl.Buffered(1))
            return pl.BlockSpec(shape, lambda i, k: (0, 0))

        if kt > 1:
            w2_spec = pl.BlockSpec((hp, tk), lambda i, k: (0, k))
        else:
            w2_spec = rep((hp, tk))  # block-invariant -> single buffer

        return pl.pallas_call(
            _mlp_kernel,
            out_shape=jax.ShapeDtypeStruct((1, n_pad), f32),
            grid_spec=pltpu.PrefetchScalarGridSpec(
                num_scalar_prefetch=0,
                grid=(nt, kt),
                in_specs=[
                    pl.BlockSpec((1, tn), lambda i, k: (0, i)),        # x^T
                    pl.BlockSpec((tk, 2), lambda i, k: (k, 0)),        # [w1|b1]
                    w2_spec,                                           # w2 slab
                    rep((hp, 2)),                                      # [b2|w3]
                    pl.BlockSpec(memory_space=pltpu.MemorySpace.SMEM),  # b3
                ],
                out_specs=pl.BlockSpec((1, tn), lambda i, k: (0, i)),
                scratch_shapes=[pltpu.VMEM((hp, tn), jnp.float32)],
            ),
            compiler_params=pltpu.CompilerParams(
                dimension_semantics=("parallel", "arbitrary"),
                vmem_limit_bytes=vmem_limit,
            ),
        )(xt, prep["l1cols"], prep["w2"], prep["fincols"], prep["b3"])

    try:
        out_t = call(True)
    except Exception:
        # pl.Buffered(1) not accepted by this jax build -> default buffering.
        out_t = call(False)

    return out_t[0, :N].reshape(N, 1)


def learner_forward(x, params, *, tn=None, tk=None, mxu_dtype=None):
    """Convenience wrapper: pads params on the fly (prefer prepare_* + the
    *_prepared call in loops)."""
    prep = prepare_learner_params(params, mxu_dtype=mxu_dtype)
    return learner_forward_prepared(x, prep, tn=tn, tk=tk)


def _init_params(key, hidden_size):
    k1, k2, k3, k4, k5, k6 = jax.random.split(key, 6)
    # Same structure as the PyTorch module; non-zero biases so the bias paths
    # of the kernel are actually exercised.
    return {
        "w1": jax.random.normal(k1, (hidden_size, 1), jnp.float32),
        "b1": 0.1 * jax.random.normal(k4, (1, hidden_size), jnp.float32),
        "w2": jax.random.normal(k2, (hidden_size, hidden_size), jnp.float32),
        "b2": 0.1 * jax.random.normal(k5, (1, hidden_size), jnp.float32),
        "w3": jax.random.normal(k3, (1, hidden_size), jnp.float32),
        "b3": 0.1 * jax.random.normal(k6, (1, 1), jnp.float32),
    }


def _reference(x, p):
    z1 = jax.nn.relu(x @ p["w1"].T + p["b1"])
    z2 = jax.nn.relu(z1 @ p["w2"].T + p["b2"])
    return z2 @ p["w3"].T + p["b3"]


if __name__ == "__main__":
    key = jax.random.PRNGKey(0)
    k_params, k_x = jax.random.split(key)

    # --- small default test (f32 MXU path, tight check) ------------------
    hidden_size, batch = 32, 16
    params = _init_params(k_params, hidden_size)
    x = jax.random.normal(k_x, (batch, 1), jnp.float32)
    ref = _reference(x, params)

    prep = prepare_learner_params(params)          # padding hoisted / reused
    out = jax.block_until_ready(learner_forward_prepared(x, prep))
    assert out.shape == (batch, 1)
    err = float(jnp.max(jnp.abs(out - ref)))
    assert jnp.allclose(out, ref, atol=1e-3, rtol=1e-3), f"max abs err {err}"

    # --- bf16-MXU path (what large-H configs use on v6e/v7x) --------------
    out_bf16 = jax.block_until_ready(
        learner_forward(x, params, mxu_dtype=jnp.bfloat16))
    err_bf16 = float(jnp.max(jnp.abs(out_bf16 - ref)))
    assert err_bf16 < 5e-2 * (float(jnp.max(jnp.abs(ref))) + 1.0), err_bf16

    # --- multi-tile test: 2 batch tiles x 2 contraction tiles -------------
    hidden2, batch2 = 200, 300
    params2 = _init_params(jax.random.PRNGKey(1), hidden2)
    x2 = jax.random.normal(jax.random.PRNGKey(2), (batch2, 1), jnp.float32)
    ref2 = _reference(x2, params2)
    prep2 = prepare_learner_params(params2)        # hp=256, f32 MXU
    out2 = jax.block_until_ready(
        learner_forward_prepared(x2, prep2, tk=128))   # kt=2, nt=2
    assert out2.shape == (batch2, 1)
    err2 = float(jnp.max(jnp.abs(out2 - ref2)))
    assert jnp.allclose(out2, ref2, atol=2e-3, rtol=2e-3), f"max abs err {err2}"

    print("KERNEL_OK")
</pallas_src>

<mosaic_0001>
module attributes {stable_mosaic.version = 11 : i64} {
  func.func @_mlp_kernel(%arg0: i32, %arg1: i32, %arg2: memref<1x128xf32, #tpu.memory_space<vmem>>, %arg3: memref<128x2xf32, #tpu.memory_space<vmem>>, %arg4: memref<128x128xf32, #tpu.memory_space<vmem>>, %arg5: memref<128x2xf32, #tpu.memory_space<vmem>>, %arg6: memref<1x1xf32, #tpu.memory_space<smem>>, %arg7: memref<1x128xf32, #tpu.memory_space<vmem>>, %arg8: memref<128x128xf32, #tpu.memory_space<vmem>>) attributes {dimension_semantics = [#tpu.dimension_semantics<parallel>, #tpu.dimension_semantics<arbitrary>], iteration_bounds = array<i64: 1, 1>, scalar_prefetch = 0 : i64, scratch_operands = 1 : i64, tpu.core_type = #tpu.core_type<tc>, window_params = [{transform_indices = @transform_0, window_bounds = array<i64: 1, 128>}, {transform_indices = @transform_1, window_bounds = array<i64: 128, 2>}, {pipeline_mode = #tpu.pipeline_mode<synchronous>, transform_indices = @transform_2, window_bounds = array<i64: 128, 128>}, {pipeline_mode = #tpu.pipeline_mode<synchronous>, transform_indices = @transform_3, window_bounds = array<i64: 128, 2>}, {transform_indices = @transform_4, window_bounds = array<i64: 1, 1>}, {transform_indices = @transform_5, window_bounds = array<i64: 1, 128>}]} {
    %c0 = arith.constant 0 : index
    %c0_0 = arith.constant 0 : index
    %0 = vector.load %arg2[%c0, %c0_0] : memref<1x128xf32, #tpu.memory_space<vmem>>, vector<1x128xf32>
    %c0_1 = arith.constant 0 : index
    %c0_2 = arith.constant 0 : index
    %1 = vector.load %arg3[%c0_1, %c0_2] : memref<128x2xf32, #tpu.memory_space<vmem>>, vector<128x2xf32>
    %2 = vector.extract_strided_slice %1 {offsets = [0, 0], sizes = [128, 1], strides = [1, 1]} : vector<128x2xf32> to vector<128x1xf32>
    %3 = vector.extract_strided_slice %1 {offsets = [0, 1], sizes = [128, 1], strides = [1, 1]} : vector<128x2xf32> to vector<128x1xf32>
    %4 = vector.broadcast %2 : vector<128x1xf32> to vector<128x128xf32>
    %5 = vector.broadcast %0 : vector<1x128xf32> to vector<128x128xf32>
    %6 = arith.mulf %4, %5 : vector<128x128xf32>
    %7 = vector.broadcast %3 : vector<128x1xf32> to vector<128x128xf32>
    %8 = arith.addf %6, %7 : vector<128x128xf32>
    %cst = arith.constant 0.000000e+00 : f32
    %9 = vector.broadcast %cst : f32 to vector<128x128xf32>
    %10 = arith.maximumf %8, %9 : vector<128x128xf32>
    %c0_i32 = arith.constant 0 : i32
    %11 = arith.cmpi eq, %arg1, %c0_i32 : i32
    %12 = arith.extui %11 : i1 to i32
    %c0_i32_3 = arith.constant 0 : i32
    %13 = arith.cmpi ne, %12, %c0_i32_3 : i32
    scf.if %13 {
      %cst_13 = arith.constant 0.000000e+00 : f32
      %22 = vector.broadcast %cst_13 : f32 to vector<128x128xf32>
      %c0_14 = arith.constant 0 : index
      %c0_15 = arith.constant 0 : index
      %23 = vector.load %arg8[%c0_14, %c0_15] : memref<128x128xf32, #tpu.memory_space<vmem>>, vector<128x128xf32>
      tpu.vector_store %arg8[%c0_14, %c0_15], %22 {strides = array<i32>} : memref<128x128xf32, #tpu.memory_space<vmem>>, vector<128x128xf32>,
    } else {
    }
    %c0_4 = arith.constant 0 : index
    %c0_5 = arith.constant 0 : index
    %14 = vector.load %arg8[%c0_4, %c0_5] : memref<128x128xf32, #tpu.memory_space<vmem>>, vector<128x128xf32>
    %c0_6 = arith.constant 0 : index
    %c0_7 = arith.constant 0 : index
    %15 = vector.load %arg4[%c0_6, %c0_7] : memref<128x128xf32, #tpu.memory_space<vmem>>, vector<128x128xf32>
    %cst_8 = arith.constant dense<0.000000e+00> : vector<128x128xf32>
    %16 = tpu.matmul %15, %10, %cst_8 {dimension_numbers = #tpu.dot_dimension_numbers<[1], [0], [0], [1], [0, 0, 1, 1], [], []>} : vector<128x128xf32>, vector<128x128xf32>, vector<128x128xf32> -> vector<128x128xf32>
    %17 = arith.addf %14, %16 : vector<128x128xf32>
    %c0_9 = arith.constant 0 : index
    %c0_10 = arith.constant 0 : index
    %18 = vector.load %arg8[%c0_9, %c0_10] : memref<128x128xf32, #tpu.memory_space<vmem>>, vector<128x128xf32>
    tpu.vector_store %arg8[%c0_9, %c0_10], %17 {strides = array<i32>} : memref<128x128xf32, #tpu.memory_space<vmem>>, vector<128x128xf32>,
    %c0_i32_11 = arith.constant 0 : i32
    %19 = arith.cmpi eq, %arg1, %c0_i32_11 : i32
    %20 = arith.extui %19 : i1 to i32
    %c0_i32_12 = arith.constant 0 : i32
    %21 = arith.cmpi ne, %20, %c0_i32_12 : i32
    scf.if %21 {
      %c0_13 = arith.constant 0 : index
      %c0_14 = arith.constant 0 : index
      %22 = vector.load %arg5[%c0_13, %c0_14] : memref<128x2xf32, #tpu.memory_space<vmem>>, vector<128x2xf32>
      %23 = vector.extract_strided_slice %22 {offsets = [0, 0], sizes = [128, 1], strides = [1, 1]} : vector<128x2xf32> to vector<128x1xf32>
      %24 = vector.extract_strided_slice %22 {offsets = [0, 1], sizes = [128, 1], strides = [1, 1]} : vector<128x2xf32> to vector<128x1xf32>
      %c0_15 = arith.constant 0 : index
      %c0_16 = arith.constant 0 : index
      %25 = vector.load %arg8[%c0_15, %c0_16] : memref<128x128xf32, #tpu.memory_space<vmem>>, vector<128x128xf32>
      %26 = vector.broadcast %23 : vector<128x1xf32> to vector<128x128xf32>
      %27 = arith.addf %25, %26 : vector<128x128xf32>
      %cst_17 = arith.constant 0.000000e+00 : f32
      %28 = vector.broadcast %cst_17 : f32 to vector<128x128xf32>
      %29 = arith.maximumf %27, %28 : vector<128x128xf32>
      %30 = vector.broadcast %24 : vector<128x1xf32> to vector<128x128xf32>
      %31 = arith.mulf %29, %30 : vector<128x128xf32>
      %cst_18 = arith.constant dense<0.000000e+00> : vector<128xf32>
      %32 = vector.multi_reduction <add>, %31, %cst_18 [0] : vector<128x128xf32> to vector<128xf32>
      %33 = vector.shape_cast %32 : vector<128xf32> to vector<1x128xf32>
      %c0_19 = arith.constant 0 : index
      %c0_20 = arith.constant 0 : index
      %34 = memref.load %arg6[%c0_19, %c0_20] : memref<1x1xf32, #tpu.memory_space<smem>>
      %35 = vector.broadcast %34 : f32 to vector<1x128xf32>
      %36 = arith.addf %33, %35 : vector<1x128xf32>
      %c0_21 = arith.constant 0 : index
      %c0_22 = arith.constant 0 : index
      %37 = vector.load %arg7[%c0_21, %c0_22] : memref<1x128xf32, #tpu.memory_space<vmem>>, vector<1x128xf32>
      tpu.vector_store %arg7[%c0_21, %c0_22], %36 {strides = array<i32>} : memref<1x128xf32, #tpu.memory_space<vmem>>, vector<1x128xf32>,
    } else {
    }
    return
  }
  func.func @transform_0(%arg0: i32, %arg1: i32) -> (i32, i32) {
    %c0_i32 = arith.constant 0 : i32
    %c0_i32_0 = arith.constant 0 : i32
    return %c0_i32, %arg0 : i32, i32
  }
  func.func @transform_1(%arg0: i32, %arg1: i32) -> (i32, i32) {
    %c0_i32 = arith.constant 0 : i32
    %c0_i32_0 = arith.constant 0 : i32
    return %arg1, %c0_i32 : i32, i32
  }
  func.func @transform_2(%arg0: i32, %arg1: i32) -> (i32, i32) {
    %c0_i32 = arith.constant 0 : i32
    %c0_i32_0 = arith.constant 0 : i32
    %c0_i32_1 = arith.constant 0 : i32
    return %c0_i32, %c0_i32_0 : i32, i32
  }
  func.func @transform_3(%arg0: i32, %arg1: i32) -> (i32, i32) {
    %c0_i32 = arith.constant 0 : i32
    %c0_i32_0 = arith.constant 0 : i32
    %c0_i32_1 = arith.constant 0 : i32
    return %c0_i32, %c0_i32_0 : i32, i32
  }
  func.func @transform_4(%arg0: i32, %arg1: i32) -> (i32, i32) {
    %c0_i32 = arith.constant 0 : i32
    %c0_i32_0 = arith.constant 0 : i32
    %c0_i32_1 = arith.constant 0 : i32
    return %c0_i32, %c0_i32_0 : i32, i32
  }
  func.func @transform_5(%arg0: i32, %arg1: i32) -> (i32, i32) {
    %c0_i32 = arith.constant 0 : i32
    %c0_i32_0 = arith.constant 0 : i32
    return %c0_i32, %arg0 : i32, i32
  }
}

module attributes {stable_mosaic.version = 11 : i64} {
  func.func @_mlp_kernel(%arg0: i32, %arg1: i32, %arg2: memref<1x128xf32, #tpu.memory_space<vmem>>, %arg3: memref<128x2xf32, #tpu.memory_space<vmem>>, %arg4: memref<128x128xf32, #tpu.memory_space<vmem>>, %arg5: memref<128x2xf32, #tpu.memory_space<vmem>>, %arg6: memref<1x1xf32, #tpu.memory_space<smem>>, %arg7: memref<1x128xf32, #tpu.memory_space<vmem>>, %arg8: memref<128x128xf32, #tpu.memory_space<vmem>>) attributes {dimension_semantics = [#tpu.dimension_semantics<parallel>, #tpu.dimension_semantics<arbitrary>], iteration_bounds = array<i64: 1, 1>, scalar_prefetch = 0 : i64, scratch_operands = 1 : i64, tpu.core_type = #tpu.core_type<tc>, window_params = [{transform_indices = @transform_0, window_bounds = array<i64: 1, 128>}, {transform_indices = @transform_1, window_bounds = array<i64: 128, 2>}, {pipeline_mode = #tpu.pipeline_mode<synchronous>, transform_indices = @transform_2, window_bounds = array<i64: 128, 128>}, {pipeline_mode = #tpu.pipeline_mode<synchronous>, transform_indices = @transform_3, window_bounds = array<i64: 128, 2>}, {transform_indices = @transform_4, window_bounds = array<i64: 1, 1>}, {transform_indices = @transform_5, window_bounds = array<i64: 1, 128>}]} {
    %c0 = arith.constant 0 : index
    %c0_0 = arith.constant 0 : index
    %0 = vector.load %arg2[%c0, %c0_0] : memref<1x128xf32, #tpu.memory_space<vmem>>, vector<1x128xf32>
    %c0_1 = arith.constant 0 : index
    %c0_2 = arith.constant 0 : index
    %1 = vector.load %arg3[%c0_1, %c0_2] : memref<128x2xf32, #tpu.memory_space<vmem>>, vector<128x2xf32>
    %2 = vector.extract_strided_slice %1 {offsets = [0, 0], sizes = [128, 1], strides = [1, 1]} : vector<128x2xf32> to vector<128x1xf32>
    %3 = vector.extract_strided_slice %1 {offsets = [0, 1], sizes = [128, 1], strides = [1, 1]} : vector<128x2xf32> to vector<128x1xf32>
    %4 = vector.broadcast %2 : vector<128x1xf32> to vector<128x128xf32>
    %5 = vector.broadcast %0 : vector<1x128xf32> to vector<128x128xf32>
    %6 = arith.mulf %4, %5 : vector<128x128xf32>
    %7 = vector.broadcast %3 : vector<128x1xf32> to vector<128x128xf32>
    %8 = arith.addf %6, %7 : vector<128x128xf32>
    %cst = arith.constant 0.000000e+00 : f32
    %9 = vector.broadcast %cst : f32 to vector<128x128xf32>
    %10 = arith.maximumf %8, %9 : vector<128x128xf32>
    %c0_i32 = arith.constant 0 : i32
    %11 = arith.cmpi eq, %arg1, %c0_i32 : i32
    %12 = arith.extui %11 : i1 to i32
    %c0_i32_3 = arith.constant 0 : i32
    %13 = arith.cmpi ne, %12, %c0_i32_3 : i32
    scf.if %13 {
      %cst_13 = arith.constant 0.000000e+00 : f32
      %22 = vector.broadcast %cst_13 : f32 to vector<128x128xf32>
      %c0_14 = arith.constant 0 : index
      %c0_15 = arith.constant 0 : index
      %23 = vector.load %arg8[%c0_14, %c0_15] : memref<128x128xf32, #tpu.memory_space<vmem>>, vector<128x128xf32>
      tpu.vector_store %arg8[%c0_14, %c0_15], %22 {strides = array<i32>} : memref<128x128xf32, #tpu.memory_space<vmem>>, vector<128x128xf32>,
    } else {
    }
    %c0_4 = arith.constant 0 : index
    %c0_5 = arith.constant 0 : index
    %14 = vector.load %arg8[%c0_4, %c0_5] : memref<128x128xf32, #tpu.memory_space<vmem>>, vector<128x128xf32>
    %c0_6 = arith.constant 0 : index
    %c0_7 = arith.constant 0 : index
    %15 = vector.load %arg4[%c0_6, %c0_7] : memref<128x128xf32, #tpu.memory_space<vmem>>, vector<128x128xf32>
    %cst_8 = arith.constant dense<0.000000e+00> : vector<128x128xf32>
    %16 = tpu.matmul %15, %10, %cst_8 {dimension_numbers = #tpu.dot_dimension_numbers<[1], [0], [0], [1], [0, 0, 1, 1], [], []>} : vector<128x128xf32>, vector<128x128xf32>, vector<128x128xf32> -> vector<128x128xf32>
    %17 = arith.addf %14, %16 : vector<128x128xf32>
    %c0_9 = arith.constant 0 : index
    %c0_10 = arith.constant 0 : index
    %18 = vector.load %arg8[%c0_9, %c0_10] : memref<128x128xf32, #tpu.memory_space<vmem>>, vector<128x128xf32>
    tpu.vector_store %arg8[%c0_9, %c0_10], %17 {strides = array<i32>} : memref<128x128xf32, #tpu.memory_space<vmem>>, vector<128x128xf32>,
    %c0_i32_11 = arith.constant 0 : i32
    %19 = arith.cmpi eq, %arg1, %c0_i32_11 : i32
    %20 = arith.extui %19 : i1 to i32
    %c0_i32_12 = arith.constant 0 : i32
    %21 = arith.cmpi ne, %20, %c0_i32_12 : i32
    scf.if %21 {
      %c0_13 = arith.constant 0 : index
      %c0_14 = arith.constant 0 : index
      %22 = vector.load %arg5[%c0_13, %c0_14] : memref<128x2xf32, #tpu.memory_space<vmem>>, vector<128x2xf32>
      %23 = vector.extract_strided_slice %22 {offsets = [0, 0], sizes = [128, 1], strides = [1, 1]} : vector<128x2xf32> to vector<128x1xf32>
      %24 = vector.extract_strided_slice %22 {offsets = [0, 1], sizes = [128, 1], strides = [1, 1]} : vector<128x2xf32> to vector<128x1xf32>
      %c0_15 = arith.constant 0 : index
      %c0_16 = arith.constant 0 : index
      %25 = vector.load %arg8[%c0_15, %c0_16] : memref<128x128xf32, #tpu.memory_space<vmem>>, vector<128x128xf32>
      %26 = vector.broadcast %23 : vector<128x1xf32> to vector<128x128xf32>
      %27 = arith.addf %25, %26 : vector<128x128xf32>
      %cst_17 = arith.constant 0.000000e+00 : f32
      %28 = vector.broadcast %cst_17 : f32 to vector<128x128xf32>
      %29 = arith.maximumf %27, %28 : vector<128x128xf32>
      %30 = vector.broadcast %24 : vector<128x1xf32> to vector<128x128xf32>
      %31 = arith.mulf %29, %30 : vector<128x128xf32>
      %cst_18 = arith.constant dense<0.000000e+00> : vector<128xf32>
      %32 = vector.multi_reduction <add>, %31, %cst_18 [0] : vector<128x128xf32> to vector<128xf32>
      %33 = vector.shape_cast %32 : vector<128xf32> to vector<1x128xf32>
      %c0_19 = arith.constant 0 : index
      %c0_20 = arith.constant 0 : index
      %34 = memref.load %arg6[%c0_19, %c0_20] : memref<1x1xf32, #tpu.memory_space<smem>>
      %35 = vector.broadcast %34 : f32 to vector<1x128xf32>
      %36 = arith.addf %33, %35 : vector<1x128xf32>
      %c0_21 = arith.constant 0 : index
      %c0_22 = arith.constant 0 : index
      %37 = vector.load %arg7[%c0_21, %c0_22] : memref<1x128xf32, #tpu.memory_space<vmem>>, vector<1x128xf32>
      tpu.vector_store %arg7[%c0_21, %c0_22], %36 {strides = array<i32>} : memref<1x128xf32, #tpu.memory_space<vmem>>, vector<1x128xf32>,
    } else {
    }
    return
  }
  func.func @transform_0(%arg0: i32, %arg1: i32) -> (i32, i32) {
    %c0_i32 = arith.constant 0 : i32
    %c0_i32_0 = arith.constant 0 : i32
    return %c0_i32, %arg0 : i32, i32
  }
  func.func @transform_1(%arg0: i32, %arg1: i32) -> (i32, i32) {
    %c0_i32 = arith.constant 0 : i32
    %c0_i32_0 = arith.constant 0 : i32
    return %arg1, %c0_i32 : i32, i32
  }
  func.func @transform_2(%arg0: i32, %arg1: i32) -> (i32, i32) {
    %c0_i32 = arith.constant 0 : i32
    %c0_i32_0 = arith.constant 0 : i32
    %c0_i32_1 = arith.constant 0 : i32
    return %c0_i32, %c0_i32_0 : i32, i32
  }
  func.func @transform_3(%arg0: i32, %arg1: i32) -> (i32, i32) {
    %c0_i32 = arith.constant 0 : i32
    %c0_i32_0 = arith.constant 0 : i32
    %c0_i32_1 = arith.constant 0 : i32
    return %c0_i32, %c0_i32_0 : i32, i32
  }
  func.func @transform_4(%arg0: i32, %arg1: i32) -> (i32, i32) {
    %c0_i32 = arith.constant 0 : i32
    %c0_i32_0 = arith.constant 0 : i32
    %c0_i32_1 = arith.constant 0 : i32
    return %c0_i32, %c0_i32_0 : i32, i32
  }
  func.func @transform_5(%arg0: i32, %arg1: i32) -> (i32, i32) {
    %c0_i32 = arith.constant 0 : i32
    %c0_i32_0 = arith.constant 0 : i32
    return %c0_i32, %arg0 : i32, i32
  }
}

</mosaic_0001>

<bundles_post_ra>
// kernel: tpu_custom_call.1
= control target key start
LH: loop header
LB: loop body
LE: loop exit
PB: predicated region body
PF: predicated region fallthrough
CT: control target
= control target key end

     0   :  { %v920_v2 = vmov 1   ;;  %s1163_s0 = inlined_call_operand.vmem [shape: f32[1,128], index: 0, kind: input, shape index: {}]   ;;  %s1164_s1 = inlined_call_operand.vmem [shape: f32[128,2], index: 1, kind: input, shape index: {}]   ;;  %s1165_s2 = inlined_call_operand.vmem [shape: f32[128,128], index: 2, kind: input, shape index: {}]   ;;  %s1166_s3 = inlined_call_operand.vmem [shape: f32[128,2], index: 3, kind: input, shape index: {}]   ;;  %s1167_s4 = inlined_call_operand.<no memory space> [shape: f32[1,1], index: 4, kind: input, shape index: {}]   ;;  %s1168_s5 = inlined_call_operand.hbm [shape: f32[1,128], index: 5, kind: output, shape index: {}]  }
   0x1   :  { %v25_v0 = vld [vmem:[%s1164_s1 + $0x10] sm:$0xff]  ;;  %v23_v1 = vld [vmem:[%s1164_s1] sm:$0xff]  ;;  %874 = vset.pattern.permute.xlu0 %v920_v2  ;;  %872 = vset.pattern.permute.xlu1 %v920_v2  ;;  %v24_v4 = vld [vmem:[%s1164_s1 + $0x8] sm:$0xff] }
   0x2   :  { %150 = vperm.xlu0 %874, %v25_v0   ;;  %142 = vperm.xlu1 %872, %v23_v1   ;;  %v29_v3 = vld [vmem:[%s1164_s1 + $0x30] sm:$0xff] }
   0x3   :  { %11 = vsyncpa [#allocation5], 0  ;;  %v33_v5 = vld [vmem:[%s1164_s1 + $0x50] sm:$0xff]  ;;  %v26_v6 = vld [vmem:[%s1164_s1 + $0x18] sm:$0xff]  ;;  %v921_v7 = vmov 0   ;;  %s922_s10 = smov [#allocation4]  }
   0x4   :  { %v27_v8 = vld [vmem:[%s1164_s1 + $0x20] sm:$0xff]  ;;  %v28_v9 = vld [vmem:[%s1164_s1 + $0x28] sm:$0xff]  ;;  %v30_v11 = vld [vmem:[%s1164_s1 + $0x38] sm:$0xff]  ;;  %s724_s11 = sshll.u32 %s922_s10, 4  ;;  %s725_s11 = int_to_ptr.vmem [resolvable:$true] %s724_s11 }
   0x5   :  { %v32_v10 = vld [vmem:[%s1164_s1 + $0x48] sm:$0xff]  ;;  %v31_v13 = vld [vmem:[%s1164_s1 + $0x40] sm:$0xff]  ;;  %v37_v14 = vld [vmem:[%s1164_s1 + $0x70] sm:$0xff]  ;;  %s896_s12 = scalar_lea.vmem %s725_s11, 16  ;;  %s900_s13 = scalar_lea.vmem %s725_s11, 32 }
   0x6   :  { %166 = vperm.xlu0 %874, %v29_v3   ;;  %146 = vperm.xlu1 %872, %v24_v4   ;;  %v36_v12 = vld [vmem:[%s1164_s1 + $0x68] sm:$0xff]  ;;  %v34_v15 = vld [vmem:[%s1164_s1 + $0x58] sm:$0xff]  ;;  %v35_v16 = vld [vmem:[%s1164_s1 + $0x60] sm:$0xff]  ;;  %p897_p0 = scmp.ne.s32.totalorder %s725_s11, %s896_s12  ;;  %p901_p1 = scmp.lt.s32.totalorder %s725_s11, %s725_s11 }
   0x7   :  { %v38_v17 = vld [vmem:[%s1164_s1 + $0x78] sm:$0xff]  ;;  %v273_v18 = vld [vmem:[%s1165_s2] sm:$0xff]  ;;  %v470_v21 = vld [vmem:[%s1166_s3 + $0x8] sm:$0xff]  ;;  %p902_p2 = scmp.lt.s32.totalorder %s900_s13, %s896_s12 }
   0x8   :  { %v281_v19 = vld [vmem:[%s1165_s2 + $0x40] sm:$0xff]  ;;  %797 = vmatprep.mubr.f32.mxu0 %v273_v18  ;;  %v471_v22 = vld [vmem:[%s1166_s3 + $0x10] sm:$0xff]  ;;  %v472_v23 = vld [vmem:[%s1166_s3 + $0x18] sm:$0xff] }
   0x9   :  { %809 = vmatprep.mubr.f32.mxu1 %v281_v19  ;;  %v469_v20 = vld [vmem:[%s1166_s3] sm:$0xff]  ;;  %v474_v25 = vld [vmem:[%s1166_s3 + $0x28] sm:$0xff]  ;;  %v475_v26 = vld [vmem:[%s1166_s3 + $0x30] sm:$0xff]  ;;  %p903_p3 = por %p902_p2, %p901_p1 }
   0xa   :  { %182 = vperm.xlu0 %874, %v33_v5   ;;  %873 = vset.pattern.permute.xlu1 %v921_v7  ;;  %v473_v24 = vld [vmem:[%s1166_s3 + $0x20] sm:$0xff]  ;;  %v476_v29 = vld [vmem:[%s1166_s3 + $0x38] sm:$0xff]  ;;  %v478_v35 = vld [vmem:[%s1166_s3 + $0x48] sm:$0xff] }
   0xb   :  { %56 = vperm.xlu1 %873, %v26_v6   ;;  %v477_v32 = vld [vmem:[%s1166_s3 + $0x40] sm:$0xff]  ;;  %v479_v38 = vld [vmem:[%s1166_s3 + $0x50] sm:$0xff]  ;;  %v480_v42 = vld [vmem:[%s1166_s3 + $0x58] sm:$0xff]  ;;  %p904_p4 = pnand %p903_p3, %p897_p0 }
   0xc   :  { %v1067_v36 = vld [vmem:[%s1163_s0] ss:$0 sm:$0xff]  ;;  %v482_v59 = vld [vmem:[%s1166_s3 + $0x68] sm:$0xff] }
   0xd   :  { %v481_v49 = vld [vmem:[%s1166_s3 + $0x60] sm:$0xff] }
   0xe   :  { %883 = vset.pattern.permute.xlu0 %v921_v7 }
   0xf   :  { %41 = vperm.xlu0 %883, %v23_v1   ;;  %875 = vset.pattern.permute.xlu1 %v920_v2 }
  0x10   :  { %154 = vperm.xlu1 %875, %v26_v6  }
  0x13   :  { %46 = vperm.xlu0 %883, %v24_v4   ;;  %v483_v4 = vld [vmem:[%s1166_s3 + $0x70] sm:$0xff] }
  0x14   :  { %876 = vset.pattern.permute.xlu1 %v921_v7 }
  0x15   :  { %61 = vperm.xlu1 %876, %v27_v8  }
  0x17   :  { %51 = vperm.xlu0 %883, %v25_v0  }
  0x19   :  { %877 = vset.pattern.permute.xlu1 %v920_v2 }
  0x1a   :  { %158 = vperm.xlu1 %877, %v27_v8  }
  0x1b   :  { %66 = vperm.xlu0 %883, %v28_v9  }
  0x1e   :  { %162 = vperm.xlu1 %877, %v28_v9  }
  0x1f   :  { %71 = vperm.xlu0 %883, %v29_v3  }
  0x22   :  { %878 = vset.pattern.permute.xlu1 %v921_v7 }
  0x23   :  { %86 = vperm.xlu0 %883, %v32_v10   ;;  %76 = vperm.xlu1 %878, %v30_v11  }
  0x27   :  { %91 = vperm.xlu0 %883, %v33_v5   ;;  %879 = vset.pattern.permute.xlu1 %v920_v2 }
  0x28   :  { %170 = vperm.xlu1 %879, %v30_v11   ;;  %v484_v11 = vld [vmem:[%s1166_s3 + $0x78] sm:$0xff] }
  0x2b   :  { %106 = vperm.xlu0 %883, %v36_v12  }
  0x2c   :  { %880 = vset.pattern.permute.xlu1 %v921_v7 }
  0x2d   :  { %81 = vperm.xlu1 %880, %v31_v13  }
  0x2f   :  { %111 = vperm.xlu0 %883, %v37_v14  }
  0x31   :  { %881 = vset.pattern.permute.xlu1 %v920_v2 }
  0x32   :  { %174 = vperm.xlu1 %881, %v31_v13  }
  0x33   :  { %888 = vset.pattern.permute.xlu0 %v920_v2 }
  0x34   :  { %198 = vperm.xlu0 %888, %v37_v14  }
  0x36   :  { %178 = vperm.xlu1 %881, %v32_v10  }
  0x38   :  { %891 = vset.pattern.permute.xlu0 %v921_v7 }
  0x39   :  { %508 = vperm.xlu0 %891, %v470_v21  }
  0x3a   :  { %882 = vset.pattern.permute.xlu1 %v921_v7 }
  0x3b   :  { %96 = vperm.xlu1 %882, %v34_v15  }
  0x3d   :  { %892 = vset.pattern.permute.xlu0 %v920_v2 }
  0x3e   :  { %614 = vperm.xlu0 %892, %v469_v20  }
  0x3f   :  { %884 = vset.pattern.permute.xlu1 %v920_v2 }
  0x40   :  { %186 = vperm.xlu1 %884, %v34_v15  }
  0x42   :  { %622 = vperm.xlu0 %892, %v471_v22  }
  0x44   :  { %885 = vset.pattern.permute.xlu1 %v921_v7 }
  0x45   :  { %101 = vperm.xlu1 %885, %v35_v16  }
  0x46   :  { %626 = vperm.xlu0 %892, %v472_v23  }
  0x49   :  { %886 = vset.pattern.permute.xlu1 %v920_v2 }
  0x4a   :  { %190 = vperm.xlu1 %886, %v35_v16   ;;  %630 = vperm.xlu0 %892, %v473_v24  }
  0x4e   :  { %194 = vperm.xlu1 %886, %v36_v12   ;;  %634 = vperm.xlu0 %892, %v474_v25  }
  0x52   :  { %887 = vset.pattern.permute.xlu1 %v921_v7  ;;  %638 = vperm.xlu0 %892, %v475_v26  }
  0x53   :  { %116 = vperm.xlu1 %887, %v38_v17  }
  0x56   :  { %642 = vperm.xlu0 %892, %v476_v29  }
  0x57   :  { %889 = vset.pattern.permute.xlu1 %v920_v2 }
  0x58   :  { %202 = vperm.xlu1 %889, %v38_v17  }
  0x5a   :  { %646 = vperm.xlu0 %892, %v477_v32  }
  0x5c   :  { %890 = vset.pattern.permute.xlu1 %v921_v7 }
  0x5d   :  { %503 = vperm.xlu1 %890, %v469_v20  }
  0x5e   :  { %650 = vperm.xlu0 %892, %v478_v35  }
  0x61   :  { %513 = vperm.xlu1 %890, %v471_v22  }
  0x62   :  { %654 = vperm.xlu0 %892, %v479_v38  }
  0x65   :  { %518 = vperm.xlu1 %890, %v472_v23  }
  0x66   :  { %658 = vperm.xlu0 %892, %v480_v42  }
  0x69   :  { %893 = vset.pattern.permute.xlu1 %v920_v2 }
  0x6a   :  { %618 = vperm.xlu1 %893, %v470_v21   ;;  %662 = vperm.xlu0 %892, %v481_v49  }
  0x6e   :  { %894 = vset.pattern.permute.xlu1 %v921_v7  ;;  %666 = vperm.xlu0 %892, %v482_v59  }
  0x6f   :  { %523 = vperm.xlu1 %894, %v473_v24  }
  0x72   :  { %674 = vperm.xlu0 %892, %v484_v11  }
  0x73   :  { %528 = vperm.xlu1 %894, %v474_v25  }
  0x77   :  { %533 = vperm.xlu1 %894, %v475_v26  }
  0x7b   :  { %538 = vperm.xlu1 %894, %v476_v29  }
  0x7f   :  { %543 = vperm.xlu1 %894, %v477_v32  }
  0x81   :  { %v143_v27 = vpop.permute.xlu1 %142  ;;  %v151_v28 = vpop.permute.xlu0 %150 }
  0x83   :  { %548 = vperm.xlu1 %894, %v478_v35  }
  0x85   :  { %v147_v30 = vpop.permute.xlu1 %146  ;;  %v1054_v31 = vpop.permute.xlu0 %166 }
  0x87   :  { %553 = vperm.xlu1 %894, %v479_v38  }
  0x89   :  { %v1059_v33 = vpop.permute.xlu0 %182 }
  0x8a   :  { %v57_v34 = vpop.permute.xlu1 %56 }
  0x8b   :  { %v128_v46 = vmul.f32 %v1067_v36, %v57_v34  ;;  %558 = vperm.xlu1 %894, %v480_v42  }
  0x8e   :  { %v42_v37 = vpop.permute.xlu0 %41 }
  0x8f   :  { %v125_v39 = vmul.f32 %v1067_v36, %v42_v37  ;;  %v155_v40 = vpop.permute.xlu1 %154  ;;  %563 = vperm.xlu1 %894, %v481_v49  }
  0x90   :  { %v208_v51 = vadd.f32 %v155_v40, %v128_v46 }
  0x91   :  { %v205_v43 = vadd.f32 %v143_v27, %v125_v39 }
  0x92   :  { %v47_v41 = vpop.permute.xlu0 %46  ;;  %v224_v60 = vmax.f32 %v208_v51, 0.0 }
  0x93   :  { %v126_v44 = vmul.f32 %v1067_v36, %v47_v41  ;;  %v221_v50 = vmax.f32 %v205_v43, 0.0  ;;  %568 = vperm.xlu1 %894, %v482_v59  }
  0x94   :  { %v62_v45 = vpop.permute.xlu1 %61 }
  0x95   :  { %v206_v47 = vadd.f32 %v147_v30, %v126_v44  ;;  %v129_v57 = vmul.f32 %v1067_v36, %v62_v45 }
  0x96   :  { %v52_v48 = vpop.permute.xlu0 %51 }
  0x97   :  { %v222_v52 = vmax.f32 %v206_v47, 0.0  ;;  %v127_v53 = vmul.f32 %v1067_v36, %v52_v48  ;;  %573 = vperm.xlu1 %894, %v483_v4  }
  0x99   :  { %v821_v54 = vpack.c.bf16 %v222_v52, %v221_v50  ;;  %v207_v55 = vadd.f32 %v151_v28, %v127_v53  ;;  %v159_v56 = vpop.permute.xlu1 %158 }
  0x9a   :  { %v67_v58 = vpop.permute.xlu0 %66  ;;  %v209_v63 = vadd.f32 %v159_v56, %v129_v57 }
  0x9b   :  { %v223_v61 = vmax.f32 %v207_v55, 0.0  ;;  %v130_v62 = vmul.f32 %v1067_v36, %v67_v58  ;;  %822 = vmatprep.subr.bf16.mxu0 %v821_v54  ;;  %853 = vmatprep.subr.bf16.mxu1 %v821_v54 }
  0x9c   :  { %824 = vmatpush3.bf16.msra.mxu0 %v821_v54  ;;  %861 = vmatpush3.bf16.msra.mxu1 %v821_v54  ;;  %v225_v5 = vmax.f32 %v209_v63, 0.0  ;;  %v282_v63 = vld [vmem:[%s1165_s2 + $0x48] sm:$0xff] }
  0x9d   :  { %v825_v0 = vpack.c.bf16 %v224_v60, %v223_v61  ;;  %v163_v1 = vpop.permute.xlu1 %162  ;;  %578 = vperm.xlu1 %894, %v484_v11   ;;  %v288_v11 = vld [vmem:[%s1165_s2 + $0x78] sm:$0xff] }
  0x9e   :  { %v210_v3 = vadd.f32 %v163_v1, %v130_v62  ;;  %v72_v7 = vpop.permute.xlu0 %71  ;;  %v274_v62 = vld [vmem:[%s1165_s2 + $0x8] sm:$0xff]  ;;  %v276_v1 = vld [vmem:[%s1165_s2 + $0x18] sm:$0xff] }
  0x9f   :  { %826 = vmatprep.subr.bf16.mxu0 %v825_v0  ;;  %854 = vmatprep.subr.bf16.mxu1 %v825_v0  ;;  %v131_v9 = vmul.f32 %v1067_v36, %v72_v7  ;;  %v286_v7 = vld [vmem:[%s1165_s2 + $0x68] sm:$0xff] }
  0xa0   :  { %v226_v6 = vmax.f32 %v210_v3, 0.0  ;;  %828 = vmatpush3.bf16.msra.mxu0 %v825_v0  ;;  %862 = vmatpush3.bf16.msra.mxu1 %v825_v0  ;;  %v283_v0 = vld [vmem:[%s1165_s2 + $0x50] sm:$0xff]  ;;  %v284_v3 = vld [vmem:[%s1165_s2 + $0x58] sm:$0xff] }
  0xa1   :  { %v211_v12 = vadd.f32 %v1054_v31, %v131_v9  ;;  %895 = vset.pattern.permute.xlu1 %v920_v2  ;;  %v287_v9 = vld [vmem:[%s1165_s2 + $0x70] sm:$0xff] }
  0xa2   :  { %v829_v8 = vpack.c.bf16 %v226_v6, %v225_v5  ;;  %v77_v10 = vpop.permute.xlu1 %76  ;;  %670 = vperm.xlu1 %895, %v483_v4   ;;  %v87_v20 = vpop.permute.xlu0 %86  ;;  %v277_v4 = vld [vmem:[%s1165_s2 + $0x20] sm:$0xff]  ;;  %v278_v6 = vld [vmem:[%s1165_s2 + $0x28] sm:$0xff] }
  0xa3   :  { %v132_v13 = vmul.f32 %v1067_v36, %v77_v10  ;;  %v227_v16 = vmax.f32 %v211_v12, 0.0  ;;  %v134_v22 = vmul.f32 %v1067_v36, %v87_v20  ;;  %v285_v5 = vld [vmem:[%s1165_s2 + $0x60] sm:$0xff]  ;;  %v280_v10 = vld [vmem:[%s1165_s2 + $0x38] sm:$0xff] }
  0xa4   :  { %830 = vmatprep.subr.bf16.mxu0 %v829_v8  ;;  %855 = vmatprep.subr.bf16.mxu1 %v829_v8 }
  0xa5   :  { %832 = vmatpush3.bf16.msra.mxu0 %v829_v8  ;;  %863 = vmatpush3.bf16.msra.mxu1 %v829_v8  ;;  %v279_v8 = vld [vmem:[%s1165_s2 + $0x30] sm:$0xff] }
  0xa6   :  { %v92_v27 = vpop.permute.xlu0 %91 }
  0xa7   :  { %v171_v14 = vpop.permute.xlu1 %170  ;;  %v135_v2 = vmul.f32 %v1067_v36, %v92_v27 }
  0xa8   :  { %v212_v15 = vadd.f32 %v171_v14, %v132_v13 }
  0xa9   :  { %v215_v32 = vadd.f32 %v1059_v33, %v135_v2 }
  0xaa   :  { %v228_v17 = vmax.f32 %v212_v15, 0.0  ;;  %v107_v42 = vpop.permute.xlu0 %106 }
  0xab   :  { %v231_v38 = vmax.f32 %v215_v32, 0.0  ;;  %v138_v45 = vmul.f32 %v1067_v36, %v107_v42 }
  0xac   :  { %v833_v18 = vpack.c.bf16 %v228_v17, %v227_v16  ;;  %v82_v19 = vpop.permute.xlu1 %81 }
  0xad   :  { %v133_v23 = vmul.f32 %v1067_v36, %v82_v19 }
  0xae   :  { %834 = vmatprep.subr.bf16.mxu0 %v833_v18  ;;  %856 = vmatprep.subr.bf16.mxu1 %v833_v18  ;;  %v112_v33 = vpop.permute.xlu0 %111 }
  0xaf   :  { %836 = vmatpush3.bf16.msra.mxu0 %v833_v18  ;;  %864 = vmatpush3.bf16.msra.mxu1 %v833_v18  ;;  %v139_v51 = vmul.f32 %v1067_v36, %v112_v33 }
  0xb1   :  { %v175_v21 = vpop.permute.xlu1 %174 }
  0xb2   :  { %v213_v24 = vadd.f32 %v175_v21, %v133_v23 }
  0xb3   :  { %v199_v54 = vpop.permute.xlu0 %198 }
  0xb4   :  { %v229_v28 = vmax.f32 %v213_v24, 0.0  ;;  %v219_v55 = vadd.f32 %v199_v54, %v139_v51 }
  0xb5   :  { %v179_v25 = vpop.permute.xlu1 %178 }
  0xb6   :  { %v214_v26 = vadd.f32 %v179_v25, %v134_v22  ;;  %v235_v59 = vmax.f32 %v219_v55, 0.0 }
  0xb8   :  { %v230_v29 = vmax.f32 %v214_v26, 0.0  ;;  %v509_v15 = vpop.permute.xlu0 %508 }
  0xba   :  { %v837_v30 = vpack.c.bf16 %v230_v29, %v229_v28  ;;  %v97_v31 = vpop.permute.xlu1 %96 }
  0xbb   :  { %v136_v34 = vmul.f32 %v1067_v36, %v97_v31 }
  0xbc   :  { %838 = vmatprep.subr.bf16.mxu0 %v837_v30  ;;  %857 = vmatprep.subr.bf16.mxu1 %v837_v30 }
  0xbd   :  { %840 = vmatpush3.bf16.msra.mxu0 %v837_v30  ;;  %865 = vmatpush3.bf16.msra.mxu1 %v837_v30  ;;  %v615_v17 = vpop.permute.xlu0 %614 }
  0xbf   :  { %v187_v35 = vpop.permute.xlu1 %186 }
  0xc0   :  { %v216_v37 = vadd.f32 %v187_v35, %v136_v34 }
  0xc1   :  { %v623_v19 = vpop.permute.xlu0 %622 }
  0xc2   :  { %v232_v39 = vmax.f32 %v216_v37, 0.0 }
  0xc4   :  { %v841_v40 = vpack.c.bf16 %v232_v39, %v231_v38  ;;  %v102_v41 = vpop.permute.xlu1 %101 }
  0xc5   :  { %v137_v44 = vmul.f32 %v1067_v36, %v102_v41  ;;  %v627_v21 = vpop.permute.xlu0 %626 }
  0xc6   :  { %842 = vmatprep.subr.bf16.mxu0 %v841_v40  ;;  %858 = vmatprep.subr.bf16.mxu1 %v841_v40 }
  0xc7   :  { %844 = vmatpush3.bf16.msra.mxu0 %v841_v40  ;;  %866 = vmatpush3.bf16.msra.mxu1 %v841_v40 }
  0xc9   :  { %v191_v43 = vpop.permute.xlu1 %190  ;;  %v631_v23 = vpop.permute.xlu0 %630 }
  0xca   :  { %v217_v46 = vadd.f32 %v191_v43, %v137_v44 }
  0xcc   :  { %v233_v49 = vmax.f32 %v217_v46, 0.0 }
  0xcd   :  { %v195_v47 = vpop.permute.xlu1 %194  ;;  %v635_v25 = vpop.permute.xlu0 %634 }
  0xce   :  { %v218_v48 = vadd.f32 %v195_v47, %v138_v45 }
  0xd0   :  { %v234_v50 = vmax.f32 %v218_v48, 0.0 }
  0xd1   :  { %v639_v27 = vpop.permute.xlu0 %638 }
  0xd2   :  { %v845_v52 = vpack.c.bf16 %v234_v50, %v233_v49  ;;  %v117_v53 = vpop.permute.xlu1 %116 }
  0xd3   :  { %v140_v56 = vmul.f32 %v1067_v36, %v117_v53  ;;  %v275_v36 = vld [vmem:[%s1165_s2 + $0x10] sm:$0xff] }
  0xd4   :  { %846 = vmatprep.subr.bf16.mxu0 %v845_v52  ;;  %859 = vmatprep.subr.bf16.mxu1 %v845_v52 }
  0xd5   :  { %848 = vmatpush3.bf16.msra.mxu0 %v845_v52  ;;  %867 = vmatpush3.bf16.msra.mxu1 %v845_v52  ;;  %v643_v29 = vpop.permute.xlu0 %642 }
  0xd7   :  { %v203_v57 = vpop.permute.xlu1 %202 }
  0xd8   :  { %v220_v58 = vadd.f32 %v203_v57, %v140_v56 }
  0xd9   :  { %v647_v30 = vpop.permute.xlu0 %646 }
  0xda   :  { %v236_v60 = vmax.f32 %v220_v58, 0.0 }
  0xdc   :  { %v849_v61 = vpack.c.bf16 %v236_v60, %v235_v59  ;;  %v504_v12 = vpop.permute.xlu1 %503 }
  0xdd   :  { %v651_v40 = vpop.permute.xlu0 %650 }
  0xde   :  { %850 = vmatprep.subr.bf16.mxu0 %v849_v61  ;;  %860 = vmatprep.subr.bf16.mxu1 %v849_v61 }
  0xdf   :  { %852 = vmatpush3.bf16.msra.mxu0 %v849_v61  ;;  %868 = vmatpush3.bf16.msra.mxu1 %v849_v61 }
  0xe0   :  { %v514_v13 = vpop.permute.xlu1 %513 }
  0xe1   :  { %v655_v61 = vpop.permute.xlu0 %654 }
  0xe2   :  { %798 = vmatmul.mubr.f32.vlgmr.msra.gmra.mrb[0].mxu0 %v274_v62  ;;  %810 = vmatmul.mubr.f32.vlgmr.msra.gmra.mrb[0].mxu1 %v282_v63 }
  0xe3   :  { %800 = vmatprep.mubr.f32.mxu0 %v275_v36  ;;  %812 = vmatprep.mubr.f32.mxu1 %v283_v0 }
  0xe4   :  { %v519_v14 = vpop.permute.xlu1 %518 }
  0xe6   :  { %801 = vmatmul.mubr.f32.gmra.mrb[2].mxu0 %v276_v1  ;;  %813 = vmatmul.mubr.f32.gmra.mrb[2].mxu1 %v284_v3 }
  0xe7   :  { %803 = vmatprep.mubr.f32.mxu0 %v277_v4  ;;  %815 = vmatprep.mubr.f32.mxu1 %v285_v5 }
  0xe9   :  { %v619_v16 = vpop.permute.xlu1 %618 }
  0xea   :  { %804 = vmatmul.mubr.f32.gmra.mrb[4].mxu0 %v278_v6  ;;  %816 = vmatmul.mubr.f32.gmra.mrb[4].mxu1 %v286_v7 }
  0xeb   :  { %806 = vmatprep.mubr.f32.mxu0 %v279_v8  ;;  %818 = vmatprep.mubr.f32.mxu1 %v287_v9 }
  0xee   :  { %807 = vmatmul.mubr.f32.gmra.mrb[6].mxu0 %v280_v10  ;;  %819 = vmatmul.mubr.f32.gmra.mrb[6].mxu1 %v288_v11  ;;  %v524_v18 = vpop.permute.xlu1 %523 }
  0xf2   :  { %v529_v20 = vpop.permute.xlu1 %528 }
  0xf6   :  { %v534_v22 = vpop.permute.xlu1 %533 }
  0xfa   :  { %v539_v24 = vpop.permute.xlu1 %538 }
  0xfe   :  { %v544_v26 = vpop.permute.xlu1 %543 }
 0x102   :  { %v549_v28 = vpop.permute.xlu1 %548 }
 0x106   :  { %v554_v2 = vpop.permute.xlu1 %553 }
 0x10a   :  { %v559_v31 = vpop.permute.xlu1 %558 }
 0x10e   :  { %v564_v50 = vpop.permute.xlu1 %563 }
 0x112   :  { %v569_v11 = vpop.permute.xlu1 %568 }
 0x1b5   :  { %v799_v32 = vpop.f32.mrb[0].mxu0  ;;  %v811_v34 = vpop.f32.mrb[0].mxu1 }
 0x1b6   :  { %v582_v35 = vadd.f32 %v799_v32, %v509_v15  ;;  %v355_v37 = vpop.f32.mrb[1].mxu0  ;;  %v395_v38 = vpop.f32.mrb[1].mxu1 }
 0x1b7   :  { %v581_v39 = vadd.f32 %v504_v12, %v355_v37  ;;  %v589_v7 = vadd.f32 %v544_v26, %v395_v38  ;;  %v590_v12 = vadd.f32 %v811_v34, %v549_v28 }
 0x1b8   :  { %v598_v41 = vmax.f32 %v582_v35, 0.0 }
 0x1b9   :  { %v597_v42 = vmax.f32 %v581_v39, 0.0  ;;  %v802_v43 = vpop.f32.mrb[2].mxu0  ;;  %v814_v44 = vpop.f32.mrb[2].mxu1  ;;  %v606_v32 = vmax.f32 %v590_v12, 0.0 }
 0x1ba   :  { %v678_v45 = vmul.f32 %v619_v16, %v598_v41  ;;  %v584_v46 = vadd.f32 %v802_v43, %v519_v14  ;;  %v365_v33 = vpop.f32.mrb[3].mxu0  ;;  %v405_v47 = vpop.f32.mrb[3].mxu1  ;;  %v592_v35 = vadd.f32 %v814_v44, %v559_v31 }
 0x1bb   :  { %v677_v48 = vmul.f32 %v615_v17, %v597_v42  ;;  %v583_v49 = vadd.f32 %v514_v13, %v365_v33  ;;  %v659_v17 = vpop.permute.xlu0 %658  ;;  %v574_v39 = vpop.permute.xlu1 %573  ;;  %v686_v28 = vmul.f32 %v651_v40, %v606_v32 }
 0x1bc   :  { %v600_v52 = vmax.f32 %v584_v46, 0.0 }
 0x1bd   :  { %v693_v51 = vadd.f32 %v678_v45, %v677_v48  ;;  %v599_v53 = vmax.f32 %v583_v49, 0.0  ;;  %v805_v54 = vpop.f32.mrb[4].mxu0  ;;  %v817_v55 = vpop.f32.mrb[4].mxu1 }
 0x1be   :  { %v586_v56 = vadd.f32 %v805_v54, %v529_v20  ;;  %v375_v57 = vpop.f32.mrb[5].mxu0  ;;  %v415_v58 = vpop.f32.mrb[5].mxu1  ;;  %v680_v62 = vmul.f32 %v627_v21, %v600_v52  ;;  %v594_v34 = vadd.f32 %v817_v55, %v569_v11 }
 0x1bf   :  { %v679_v59 = vmul.f32 %v623_v19, %v599_v53  ;;  %v585_v60 = vadd.f32 %v524_v18, %v375_v57  ;;  %v605_v18 = vmax.f32 %v589_v7, 0.0  ;;  %v591_v19 = vadd.f32 %v554_v2, %v405_v47  ;;  %v663_v41 = vpop.permute.xlu0 %662 }
 0x1c0   :  { %v602_v36 = vmax.f32 %v586_v56, 0.0  ;;  %v593_v38 = vadd.f32 %v564_v50, %v415_v58  ;;  %v610_v47 = vmax.f32 %v594_v34, 0.0 }
 0x1c1   :  { %v694_v63 = vadd.f32 %v693_v51, %v679_v59  ;;  %v601_v0 = vmax.f32 %v585_v60, 0.0  ;;  %v808_v1 = vpop.f32.mrb[6].mxu0  ;;  %v820_v3 = vpop.f32.mrb[6].mxu1  ;;  %v685_v26 = vmul.f32 %v647_v30, %v605_v18 }
 0x1c2   :  { %v588_v4 = vadd.f32 %v808_v1, %v539_v24  ;;  %v385_v5 = vpop.f32.mrb[7].mxu0  ;;  %v425_v6 = vpop.f32.mrb[7].mxu1  ;;  %v682_v13 = vmul.f32 %v635_v25, %v602_v36  ;;  %v608_v25 = vmax.f32 %v592_v35, 0.0  ;;  %v609_v45 = vmax.f32 %v593_v38, 0.0 }
 0x1c3   :  { %v681_v8 = vmul.f32 %v631_v23, %v601_v0  ;;  %v695_v9 = vadd.f32 %v694_v63, %v680_v62  ;;  %v587_v10 = vadd.f32 %v534_v22, %v385_v5  ;;  %v607_v23 = vmax.f32 %v591_v19, 0.0  ;;  %v667_v44 = vpop.permute.xlu0 %666 }
 0x1c4   :  { %v604_v15 = vmax.f32 %v588_v4, 0.0  ;;  %v595_v2 = vadd.f32 %v574_v39, %v425_v6  ;;  %v688_v33 = vmul.f32 %v659_v17, %v608_v25  ;;  %v689_v48 = vmul.f32 %v663_v41, %v609_v45 }
 0x1c5   :  { %v696_v14 = vadd.f32 %v695_v9, %v681_v8  ;;  %v603_v16 = vmax.f32 %v587_v10, 0.0  ;;  %v687_v43 = vmul.f32 %v655_v61, %v607_v23  ;;  %v690_v51 = vmul.f32 %v667_v44, %v610_v47 }
 0x1c6   :  { %v684_v24 = vmul.f32 %v643_v29, %v604_v15  ;;  %v611_v30 = vmax.f32 %v595_v2, 0.0  ;;  %v715_v36 = vstv %s1167_s4 }
 0x1c7   :  { %v683_v20 = vmul.f32 %v639_v27, %v603_v16  ;;  %v697_v21 = vadd.f32 %v696_v14, %v682_v13  ;;  %v579_v27 = vpop.permute.xlu1 %578  ;;  %v675_v55 = vpop.permute.xlu0 %674 }
 0x1c8   :  { %v596_v31 = vadd.f32 %v820_v3, %v579_v27 }
 0x1c9   :  { %v698_v37 = vadd.f32 %v697_v21, %v683_v20 }
 0x1ca   :  { %v612_v52 = vmax.f32 %v596_v31, 0.0 }
 0x1cb   :  { %v699_v22 = vadd.f32 %v698_v37, %v684_v24  ;;  %v671_v50 = vpop.permute.xlu1 %670 }
 0x1cc   :  { %v691_v53 = vmul.f32 %v671_v50, %v611_v30  ;;  %v692_v56 = vmul.f32 %v675_v55, %v612_v52 }
 0x1cd   :  { %v700_v42 = vadd.f32 %v699_v22, %v685_v26 }
 0x1cf   :  { %v701_v46 = vadd.f32 %v700_v42, %v686_v28 }
 0x1d1   :  { %v702_v29 = vadd.f32 %v701_v46, %v687_v43 }
 0x1d3   :  { %v703_v49 = vadd.f32 %v702_v29, %v688_v33 }
 0x1d5   :  { %v704_v40 = vadd.f32 %v703_v49, %v689_v48 }
 0x1d7   :  { %v705_v54 = vadd.f32 %v704_v40, %v690_v51 }
 0x1d9   :  { %v706_v57 = vadd.f32 %v705_v54, %v691_v53 }
 0x1db   :  { %v707_v58 = vadd.f32 %v706_v57, %v692_v56 }
 0x1dd   :  { %v708_v59 = vrot.slane %v707_v58, 4 }
 0x1df   :  { %v709_v60 = vadd.f32 %v708_v59, %v707_v58 }
 0x1e1   :  { %v710_v61 = vrot.slane %v709_v60, 2 }
 0x1e3   :  { %v711_v62 = vadd.f32 %v710_v61, %v709_v60 }
 0x1e5   :  { %v712_v63 = vrot.slane %v711_v62, 1 }
 0x1e7   :  { %v713_v0 = vadd.f32 %v712_v63, %v711_v62 }
 0x1e9   :  { %v716_v1 = vadd.f32 %v715_v36, %v713_v0 }
 0x1eb   :  { %717 = vst [vmem:[#allocation4] sm:$0x1] %v716_v1 }
 0x1ec   :  { %907 = shalt.err (!%p904_p4)
}
 0x1ed   :  { %s908_s16 = scalar_lea.hbm %s1168_s5, 16 }
 0x1ee   :  { %p909_p5 = scmp.ne.s32.totalorder %s1168_s5, %s908_s16  ;;  %p912_p6 = scmp.lt.u32.totalorder %s908_s16, %s1168_s5 }
 0x1f0   :  { %p914_p7 = pnand %p912_p6, %p909_p5 }
 0x1f2   :  { %917 = shalt.err (!%p914_p7)
}
 0x1f3   :  { %727 = dma.vmem_to_hbm [thread:$0]  %s725_s11, 16, %s1168_s5, [#allocation5]  }
 0x1f4   :  { %918 = dma.done.wait [#allocation5], 16  }
 0x1f5   :  { %919 = vsyncadd [#allocation5], 4294967280 }
 0x1f6   :  { %731 = vsyncpa [#allocation5], 1 }

// kernel: tpu_custom_call.1
= control target key start
LH: loop header
LB: loop body
LE: loop exit
PB: predicated region body
PF: predicated region fallthrough
CT: control target
= control target key end

     0   :  { %v920_v2 = vmov 1   ;;  %s1163_s0 = inlined_call_operand.vmem [shape: f32[1,128], index: 0, kind: input, shape index: {}]   ;;  %s1164_s1 = inlined_call_operand.vmem [shape: f32[128,2], index: 1, kind: input, shape index: {}]   ;;  %s1165_s2 = inlined_call_operand.vmem [shape: f32[128,128], index: 2, kind: input, shape index: {}]   ;;  %s1166_s3 = inlined_call_operand.vmem [shape: f32[128,2], index: 3, kind: input, shape index: {}]   ;;  %s1167_s4 = inlined_call_operand.<no memory space> [shape: f32[1,1], index: 4, kind: input, shape index: {}]   ;;  %s1168_s5 = inlined_call_operand.hbm [shape: f32[1,128], index: 5, kind: output, shape index: {}]  }
   0x1   :  { %v25_v0 = vld [vmem:[%s1164_s1 + $0x10] sm:$0xff]  ;;  %v23_v1 = vld [vmem:[%s1164_s1] sm:$0xff]  ;;  %874 = vset.pattern.permute.xlu0 %v920_v2  ;;  %872 = vset.pattern.permute.xlu1 %v920_v2  ;;  %v24_v4 = vld [vmem:[%s1164_s1 + $0x8] sm:$0xff] }
   0x2   :  { %150 = vperm.xlu0 %874, %v25_v0   ;;  %142 = vperm.xlu1 %872, %v23_v1   ;;  %v29_v3 = vld [vmem:[%s1164_s1 + $0x30] sm:$0xff] }
   0x3   :  { %11 = vsyncpa [#allocation5], 0  ;;  %v33_v5 = vld [vmem:[%s1164_s1 + $0x50] sm:$0xff]  ;;  %v26_v6 = vld [vmem:[%s1164_s1 + $0x18] sm:$0xff]  ;;  %v921_v7 = vmov 0   ;;  %s922_s10 = smov [#allocation4]  }
   0x4   :  { %v27_v8 = vld [vmem:[%s1164_s1 + $0x20] sm:$0xff]  ;;  %v28_v9 = vld [vmem:[%s1164_s1 + $0x28] sm:$0xff]  ;;  %v30_v11 = vld [vmem:[%s1164_s1 + $0x38] sm:$0xff]  ;;  %s724_s11 = sshll.u32 %s922_s10, 4  ;;  %s725_s11 = int_to_ptr.vmem [resolvable:$true] %s724_s11 }
   0x5   :  { %v32_v10 = vld [vmem:[%s1164_s1 + $0x48] sm:$0xff]  ;;  %v31_v13 = vld [vmem:[%s1164_s1 + $0x40] sm:$0xff]  ;;  %v37_v14 = vld [vmem:[%s1164_s1 + $0x70] sm:$0xff]  ;;  %s896_s12 = scalar_lea.vmem %s725_s11, 16  ;;  %s900_s13 = scalar_lea.vmem %s725_s11, 32 }
   0x6   :  { %166 = vperm.xlu0 %874, %v29_v3   ;;  %146 = vperm.xlu1 %872, %v24_v4   ;;  %v36_v12 = vld [vmem:[%s1164_s1 + $0x68] sm:$0xff]  ;;  %v34_v15 = vld [vmem:[%s1164_s1 + $0x58] sm:$0xff]  ;;  %v35_v16 = vld [vmem:[%s1164_s1 + $0x60] sm:$0xff]  ;;  %p897_p0 = scmp.ne.s32.totalorder %s725_s11, %s896_s12  ;;  %p901_p1 = scmp.lt.s32.totalorder %s725_s11, %s725_s11 }
   0x7   :  { %v38_v17 = vld [vmem:[%s1164_s1 + $0x78] sm:$0xff]  ;;  %v273_v18 = vld [vmem:[%s1165_s2] sm:$0xff]  ;;  %v470_v21 = vld [vmem:[%s1166_s3 + $0x8] sm:$0xff]  ;;  %p902_p2 = scmp.lt.s32.totalorder %s900_s13, %s896_s12 }
   0x8   :  { %v281_v19 = vld [vmem:[%s1165_s2 + $0x40] sm:$0xff]  ;;  %797 = vmatprep.mubr.f32.mxu0 %v273_v18  ;;  %v471_v22 = vld [vmem:[%s1166_s3 + $0x10] sm:$0xff]  ;;  %v472_v23 = vld [vmem:[%s1166_s3 + $0x18] sm:$0xff] }
   0x9   :  { %809 = vmatprep.mubr.f32.mxu1 %v281_v19  ;;  %v469_v20 = vld [vmem:[%s1166_s3] sm:$0xff]  ;;  %v474_v25 = vld [vmem:[%s1166_s3 + $0x28] sm:$0xff]  ;;  %v475_v26 = vld [vmem:[%s1166_s3 + $0x30] sm:$0xff]  ;;  %p903_p3 = por %p902_p2, %p901_p1 }
   0xa   :  { %182 = vperm.xlu0 %874, %v33_v5   ;;  %873 = vset.pattern.permute.xlu1 %v921_v7  ;;  %v473_v24 = vld [vmem:[%s1166_s3 + $0x20] sm:$0xff]  ;;  %v476_v29 = vld [vmem:[%s1166_s3 + $0x38] sm:$0xff]  ;;  %v478_v35 = vld [vmem:[%s1166_s3 + $0x48] sm:$0xff] }
   0xb   :  { %56 = vperm.xlu1 %873, %v26_v6   ;;  %v477_v32 = vld [vmem:[%s1166_s3 + $0x40] sm:$0xff]  ;;  %v479_v38 = vld [vmem:[%s1166_s3 + $0x50] sm:$0xff]  ;;  %v480_v42 = vld [vmem:[%s1166_s3 + $0x58] sm:$0xff]  ;;  %p904_p4 = pnand %p903_p3, %p897_p0 }
   0xc   :  { %v1067_v36 = vld [vmem:[%s1163_s0] ss:$0 sm:$0xff]  ;;  %v482_v59 = vld [vmem:[%s1166_s3 + $0x68] sm:$0xff] }
   0xd   :  { %v481_v49 = vld [vmem:[%s1166_s3 + $0x60] sm:$0xff] }
   0xe   :  { %883 = vset.pattern.permute.xlu0 %v921_v7 }
   0xf   :  { %41 = vperm.xlu0 %883, %v23_v1   ;;  %875 = vset.pattern.permute.xlu1 %v920_v2 }
  0x10   :  { %154 = vperm.xlu1 %875, %v26_v6  }
  0x13   :  { %46 = vperm.xlu0 %883, %v24_v4   ;;  %v483_v4 = vld [vmem:[%s1166_s3 + $0x70] sm:$0xff] }
  0x14   :  { %876 = vset.pattern.permute.xlu1 %v921_v7 }
  0x15   :  { %61 = vperm.xlu1 %876, %v27_v8  }
  0x17   :  { %51 = vperm.xlu0 %883, %v25_v0  }
  0x19   :  { %877 = vset.pattern.permute.xlu1 %v920_v2 }
  0x1a   :  { %158 = vperm.xlu1 %877, %v27_v8  }
  0x1b   :  { %66 = vperm.xlu0 %883, %v28_v9  }
  0x1e   :  { %162 = vperm.xlu1 %877, %v28_v9  }
  0x1f   :  { %71 = vperm.xlu0 %883, %v29_v3  }
  0x22   :  { %878 = vset.pattern.permute.xlu1 %v921_v7 }
  0x23   :  { %86 = vperm.xlu0 %883, %v32_v10   ;;  %76 = vperm.xlu1 %878, %v30_v11  }
  0x27   :  { %91 = vperm.xlu0 %883, %v33_v5   ;;  %879 = vset.pattern.permute.xlu1 %v920_v2 }
  0x28   :  { %170 = vperm.xlu1 %879, %v30_v11   ;;  %v484_v11 = vld [vmem:[%s1166_s3 + $0x78] sm:$0xff] }
  0x2b   :  { %106 = vperm.xlu0 %883, %v36_v12  }
  0x2c   :  { %880 = vset.pattern.permute.xlu1 %v921_v7 }
  0x2d   :  { %81 = vperm.xlu1 %880, %v31_v13  }
  0x2f   :  { %111 = vperm.xlu0 %883, %v37_v14  }
  0x31   :  { %881 = vset.pattern.permute.xlu1 %v920_v2 }
  0x32   :  { %174 = vperm.xlu1 %881, %v31_v13  }
  0x33   :  { %888 = vset.pattern.permute.xlu0 %v920_v2 }
  0x34   :  { %198 = vperm.xlu0 %888, %v37_v14  }
  0x36   :  { %178 = vperm.xlu1 %881, %v32_v10  }
  0x38   :  { %891 = vset.pattern.permute.xlu0 %v921_v7 }
  0x39   :  { %508 = vperm.xlu0 %891, %v470_v21  }
  0x3a   :  { %882 = vset.pattern.permute.xlu1 %v921_v7 }
  0x3b   :  { %96 = vperm.xlu1 %882, %v34_v15  }
  0x3d   :  { %892 = vset.pattern.permute.xlu0 %v920_v2 }
  0x3e   :  { %614 = vperm.xlu0 %892, %v469_v20  }
  0x3f   :  { %884 = vset.pattern.permute.xlu1 %v920_v2 }
  0x40   :  { %186 = vperm.xlu1 %884, %v34_v15  }
  0x42   :  { %622 = vperm.xlu0 %892, %v471_v22  }
  0x44   :  { %885 = vset.pattern.permute.xlu1 %v921_v7 }
  0x45   :  { %101 = vperm.xlu1 %885, %v35_v16  }
  0x46   :  { %626 = vperm.xlu0 %892, %v472_v23  }
  0x49   :  { %886 = vset.pattern.permute.xlu1 %v920_v2 }
  0x4a   :  { %190 = vperm.xlu1 %886, %v35_v16   ;;  %630 = vperm.xlu0 %892, %v473_v24  }
  0x4e   :  { %194 = vperm.xlu1 %886, %v36_v12   ;;  %634 = vperm.xlu0 %892, %v474_v25  }
  0x52   :  { %887 = vset.pattern.permute.xlu1 %v921_v7  ;;  %638 = vperm.xlu0 %892, %v475_v26  }
  0x53   :  { %116 = vperm.xlu1 %887, %v38_v17  }
  0x56   :  { %642 = vperm.xlu0 %892, %v476_v29  }
  0x57   :  { %889 = vset.pattern.permute.xlu1 %v920_v2 }
  0x58   :  { %202 = vperm.xlu1 %889, %v38_v17  }
  0x5a   :  { %646 = vperm.xlu0 %892, %v477_v32  }
  0x5c   :  { %890 = vset.pattern.permute.xlu1 %v921_v7 }
  0x5d   :  { %503 = vperm.xlu1 %890, %v469_v20  }
  0x5e   :  { %650 = vperm.xlu0 %892, %v478_v35  }
  0x61   :  { %513 = vperm.xlu1 %890, %v471_v22  }
  0x62   :  { %654 = vperm.xlu0 %892, %v479_v38  }
  0x65   :  { %518 = vperm.xlu1 %890, %v472_v23  }
  0x66   :  { %658 = vperm.xlu0 %892, %v480_v42  }
  0x69   :  { %893 = vset.pattern.permute.xlu1 %v920_v2 }
  0x6a   :  { %618 = vperm.xlu1 %893, %v470_v21   ;;  %662 = vperm.xlu0 %892, %v481_v49  }
  0x6e   :  { %894 = vset.pattern.permute.xlu1 %v921_v7  ;;  %666 = vperm.xlu0 %892, %v482_v59  }
  0x6f   :  { %523 = vperm.xlu1 %894, %v473_v24  }
  0x72   :  { %674 = vperm.xlu0 %892, %v484_v11  }
  0x73   :  { %528 = vperm.xlu1 %894, %v474_v25  }
  0x77   :  { %533 = vperm.xlu1 %894, %v475_v26  }
  0x7b   :  { %538 = vperm.xlu1 %894, %v476_v29  }
  0x7f   :  { %543 = vperm.xlu1 %894, %v477_v32  }
  0x81   :  { %v143_v27 = vpop.permute.xlu1 %142  ;;  %v151_v28 = vpop.permute.xlu0 %150 }
  0x83   :  { %548 = vperm.xlu1 %894, %v478_v35  }
  0x85   :  { %v147_v30 = vpop.permute.xlu1 %146  ;;  %v1054_v31 = vpop.permute.xlu0 %166 }
  0x87   :  { %553 = vperm.xlu1 %894, %v479_v38  }
  0x89   :  { %v1059_v33 = vpop.permute.xlu0 %182 }
  0x8a   :  { %v57_v34 = vpop.permute.xlu1 %56 }
  0x8b   :  { %v128_v46 = vmul.f32 %v1067_v36, %v57_v34  ;;  %558 = vperm.xlu1 %894, %v480_v42  }
  0x8e   :  { %v42_v37 = vpop.permute.xlu0 %41 }
  0x8f   :  { %v125_v39 = vmul.f32 %v1067_v36, %v42_v37  ;;  %v155_v40 = vpop.permute.xlu1 %154  ;;  %563 = vperm.xlu1 %894, %v481_v49  }
  0x90   :  { %v208_v51 = vadd.f32 %v155_v40, %v128_v46 }
  0x91   :  { %v205_v43 = vadd.f32 %v143_v27, %v125_v39 }
  0x92   :  { %v47_v41 = vpop.permute.xlu0 %46  ;;  %v224_v60 = vmax.f32 %v208_v51, 0.0 }
  0x93   :  { %v126_v44 = vmul.f32 %v1067_v36, %v47_v41  ;;  %v221_v50 = vmax.f32 %v205_v43, 0.0  ;;  %568 = vperm.xlu1 %894, %v482_v59  }
  0x94   :  { %v62_v45 = vpop.permute.xlu1 %61 }
  0x95   :  { %v206_v47 = vadd.f32 %v147_v30, %v126_v44  ;;  %v129_v57 = vmul.f32 %v1067_v36, %v62_v45 }
  0x96   :  { %v52_v48 = vpop.permute.xlu0 %51 }
  0x97   :  { %v222_v52 = vmax.f32 %v206_v47, 0.0  ;;  %v127_v53 = vmul.f32 %v1067_v36, %v52_v48  ;;  %573 = vperm.xlu1 %894, %v483_v4  }
  0x99   :  { %v821_v54 = vpack.c.bf16 %v222_v52, %v221_v50  ;;  %v207_v55 = vadd.f32 %v151_v28, %v127_v53  ;;  %v159_v56 = vpop.permute.xlu1 %158 }
  0x9a   :  { %v67_v58 = vpop.permute.xlu0 %66  ;;  %v209_v63 = vadd.f32 %v159_v56, %v129_v57 }
  0x9b   :  { %v223_v61 = vmax.f32 %v207_v55, 0.0  ;;  %v130_v62 = vmul.f32 %v1067_v36, %v67_v58  ;;  %822 = vmatprep.subr.bf16.mxu0 %v821_v54  ;;  %853 = vmatprep.subr.bf16.mxu1 %v821_v54 }
  0x9c   :  { %824 = vmatpush3.bf16.msra.mxu0 %v821_v54  ;;  %861 = vmatpush3.bf16.msra.mxu1 %v821_v54  ;;  %v225_v5 = vmax.f32 %v209_v63, 0.0  ;;  %v282_v63 = vld [vmem:[%s1165_s2 + $0x48] sm:$0xff] }
  0x9d   :  { %v825_v0 = vpack.c.bf16 %v224_v60, %v223_v61  ;;  %v163_v1 = vpop.permute.xlu1 %162  ;;  %578 = vperm.xlu1 %894, %v484_v11   ;;  %v288_v11 = vld [vmem:[%s1165_s2 + $0x78] sm:$0xff] }
  0x9e   :  { %v210_v3 = vadd.f32 %v163_v1, %v130_v62  ;;  %v72_v7 = vpop.permute.xlu0 %71  ;;  %v274_v62 = vld [vmem:[%s1165_s2 + $0x8] sm:$0xff]  ;;  %v276_v1 = vld [vmem:[%s1165_s2 + $0x18] sm:$0xff] }
  0x9f   :  { %826 = vmatprep.subr.bf16.mxu0 %v825_v0  ;;  %854 = vmatprep.subr.bf16.mxu1 %v825_v0  ;;  %v131_v9 = vmul.f32 %v1067_v36, %v72_v7  ;;  %v286_v7 = vld [vmem:[%s1165_s2 + $0x68] sm:$0xff] }
  0xa0   :  { %v226_v6 = vmax.f32 %v210_v3, 0.0  ;;  %828 = vmatpush3.bf16.msra.mxu0 %v825_v0  ;;  %862 = vmatpush3.bf16.msra.mxu1 %v825_v0  ;;  %v283_v0 = vld [vmem:[%s1165_s2 + $0x50] sm:$0xff]  ;;  %v284_v3 = vld [vmem:[%s1165_s2 + $0x58] sm:$0xff] }
  0xa1   :  { %v211_v12 = vadd.f32 %v1054_v31, %v131_v9  ;;  %895 = vset.pattern.permute.xlu1 %v920_v2  ;;  %v287_v9 = vld [vmem:[%s1165_s2 + $0x70] sm:$0xff] }
  0xa2   :  { %v829_v8 = vpack.c.bf16 %v226_v6, %v225_v5  ;;  %v77_v10 = vpop.permute.xlu1 %76  ;;  %670 = vperm.xlu1 %895, %v483_v4   ;;  %v87_v20 = vpop.permute.xlu0 %86  ;;  %v277_v4 = vld [vmem:[%s1165_s2 + $0x20] sm:$0xff]  ;;  %v278_v6 = vld [vmem:[%s1165_s2 + $0x28] sm:$0xff] }
  0xa3   :  { %v132_v13 = vmul.f32 %v1067_v36, %v77_v10  ;;  %v227_v16 = vmax.f32 %v211_v12, 0.0  ;;  %v134_v22 = vmul.f32 %v1067_v36, %v87_v20  ;;  %v285_v5 = vld [vmem:[%s1165_s2 + $0x60] sm:$0xff]  ;;  %v280_v10 = vld [vmem:[%s1165_s2 + $0x38] sm:$0xff] }
  0xa4   :  { %830 = vmatprep.subr.bf16.mxu0 %v829_v8  ;;  %855 = vmatprep.subr.bf16.mxu1 %v829_v8 }
  0xa5   :  { %832 = vmatpush3.bf16.msra.mxu0 %v829_v8  ;;  %863 = vmatpush3.bf16.msra.mxu1 %v829_v8  ;;  %v279_v8 = vld [vmem:[%s1165_s2 + $0x30] sm:$0xff] }
  0xa6   :  { %v92_v27 = vpop.permute.xlu0 %91 }
  0xa7   :  { %v171_v14 = vpop.permute.xlu1 %170  ;;  %v135_v2 = vmul.f32 %v1067_v36, %v92_v27 }
  0xa8   :  { %v212_v15 = vadd.f32 %v171_v14, %v132_v13 }
  0xa9   :  { %v215_v32 = vadd.f32 %v1059_v33, %v135_v2 }
  0xaa   :  { %v228_v17 = vmax.f32 %v212_v15, 0.0  ;;  %v107_v42 = vpop.permute.xlu0 %106 }
  0xab   :  { %v231_v38 = vmax.f32 %v215_v32, 0.0  ;;  %v138_v45 = vmul.f32 %v1067_v36, %v107_v42 }
  0xac   :  { %v833_v18 = vpack.c.bf16 %v228_v17, %v227_v16  ;;  %v82_v19 = vpop.permute.xlu1 %81 }
  0xad   :  { %v133_v23 = vmul.f32 %v1067_v36, %v82_v19 }
  0xae   :  { %834 = vmatprep.subr.bf16.mxu0 %v833_v18  ;;  %856 = vmatprep.subr.bf16.mxu1 %v833_v18  ;;  %v112_v33 = vpop.permute.xlu0 %111 }
  0xaf   :  { %836 = vmatpush3.bf16.msra.mxu0 %v833_v18  ;;  %864 = vmatpush3.bf16.msra.mxu1 %v833_v18  ;;  %v139_v51 = vmul.f32 %v1067_v36, %v112_v33 }
  0xb1   :  { %v175_v21 = vpop.permute.xlu1 %174 }
  0xb2   :  { %v213_v24 = vadd.f32 %v175_v21, %v133_v23 }
  0xb3   :  { %v199_v54 = vpop.permute.xlu0 %198 }
  0xb4   :  { %v229_v28 = vmax.f32 %v213_v24, 0.0  ;;  %v219_v55 = vadd.f32 %v199_v54, %v139_v51 }
  0xb5   :  { %v179_v25 = vpop.permute.xlu1 %178 }
  0xb6   :  { %v214_v26 = vadd.f32 %v179_v25, %v134_v22  ;;  %v235_v59 = vmax.f32 %v219_v55, 0.0 }
  0xb8   :  { %v230_v29 = vmax.f32 %v214_v26, 0.0  ;;  %v509_v15 = vpop.permute.xlu0 %508 }
  0xba   :  { %v837_v30 = vpack.c.bf16 %v230_v29, %v229_v28  ;;  %v97_v31 = vpop.permute.xlu1 %96 }
  0xbb   :  { %v136_v34 = vmul.f32 %v1067_v36, %v97_v31 }
  0xbc   :  { %838 = vmatprep.subr.bf16.mxu0 %v837_v30  ;;  %857 = vmatprep.subr.bf16.mxu1 %v837_v30 }
  0xbd   :  { %840 = vmatpush3.bf16.msra.mxu0 %v837_v30  ;;  %865 = vmatpush3.bf16.msra.mxu1 %v837_v30  ;;  %v615_v17 = vpop.permute.xlu0 %614 }
  0xbf   :  { %v187_v35 = vpop.permute.xlu1 %186 }
  0xc0   :  { %v216_v37 = vadd.f32 %v187_v35, %v136_v34 }
  0xc1   :  { %v623_v19 = vpop.permute.xlu0 %622 }
  0xc2   :  { %v232_v39 = vmax.f32 %v216_v37, 0.0 }
  0xc4   :  { %v841_v40 = vpack.c.bf16 %v232_v39, %v231_v38  ;;  %v102_v41 = vpop.permute.xlu1 %101 }
  0xc5   :  { %v137_v44 = vmul.f32 %v1067_v36, %v102_v41  ;;  %v627_v21 = vpop.permute.xlu0 %626 }
  0xc6   :  { %842 = vmatprep.subr.bf16.mxu0 %v841_v40  ;;  %858 = vmatprep.subr.bf16.mxu1 %v841_v40 }
  0xc7   :  { %844 = vmatpush3.bf16.msra.mxu0 %v841_v40  ;;  %866 = vmatpush3.bf16.msra.mxu1 %v841_v40 }
  0xc9   :  { %v191_v43 = vpop.permute.xlu1 %190  ;;  %v631_v23 = vpop.permute.xlu0 %630 }
  0xca   :  { %v217_v46 = vadd.f32 %v191_v43, %v137_v44 }
  0xcc   :  { %v233_v49 = vmax.f32 %v217_v46, 0.0 }
  0xcd   :  { %v195_v47 = vpop.permute.xlu1 %194  ;;  %v635_v25 = vpop.permute.xlu0 %634 }
  0xce   :  { %v218_v48 = vadd.f32 %v195_v47, %v138_v45 }
  0xd0   :  { %v234_v50 = vmax.f32 %v218_v48, 0.0 }
  0xd1   :  { %v639_v27 = vpop.permute.xlu0 %638 }
  0xd2   :  { %v845_v52 = vpack.c.bf16 %v234_v50, %v233_v49  ;;  %v117_v53 = vpop.permute.xlu1 %116 }
  0xd3   :  { %v140_v56 = vmul.f32 %v1067_v36, %v117_v53  ;;  %v275_v36 = vld [vmem:[%s1165_s2 + $0x10] sm:$0xff] }
  0xd4   :  { %846 = vmatprep.subr.bf16.mxu0 %v845_v52  ;;  %859 = vmatprep.subr.bf16.mxu1 %v845_v52 }
  0xd5   :  { %848 = vmatpush3.bf16.msra.mxu0 %v845_v52  ;;  %867 = vmatpush3.bf16.msra.mxu1 %v845_v52  ;;  %v643_v29 = vpop.permute.xlu0 %642 }
  0xd7   :  { %v203_v57 = vpop.permute.xlu1 %202 }
  0xd8   :  { %v220_v58 = vadd.f32 %v203_v57, %v140_v56 }
  0xd9   :  { %v647_v30 = vpop.permute.xlu0 %646 }
  0xda   :  { %v236_v60 = vmax.f32 %v220_v58, 0.0 }
  0xdc   :  { %v849_v61 = vpack.c.bf16 %v236_v60, %v235_v59  ;;  %v504_v12 = vpop.permute.xlu1 %503 }
  0xdd   :  { %v651_v40 = vpop.permute.xlu0 %650 }
  0xde   :  { %850 = vmatprep.subr.bf16.mxu0 %v849_v61  ;;  %860 = vmatprep.subr.bf16.mxu1 %v849_v61 }
  0xdf   :  { %852 = vmatpush3.bf16.msra.mxu0 %v849_v61  ;;  %868 = vmatpush3.bf16.msra.mxu1 %v849_v61 }
  0xe0   :  { %v514_v13 = vpop.permute.xlu1 %513 }
  0xe1   :  { %v655_v61 = vpop.permute.xlu0 %654 }
  0xe2   :  { %798 = vmatmul.mubr.f32.vlgmr.msra.gmra.mrb[0].mxu0 %v274_v62  ;;  %810 = vmatmul.mubr.f32.vlgmr.msra.gmra.mrb[0].mxu1 %v282_v63 }
  0xe3   :  { %800 = vmatprep.mubr.f32.mxu0 %v275_v36  ;;  %812 = vmatprep.mubr.f32.mxu1 %v283_v0 }
  0xe4   :  { %v519_v14 = vpop.permute.xlu1 %518 }
  0xe6   :  { %801 = vmatmul.mubr.f32.gmra.mrb[2].mxu0 %v276_v1  ;;  %813 = vmatmul.mubr.f32.gmra.mrb[2].mxu1 %v284_v3 }
  0xe7   :  { %803 = vmatprep.mubr.f32.mxu0 %v277_v4  ;;  %815 = vmatprep.mubr.f32.mxu1 %v285_v5 }
  0xe9   :  { %v619_v16 = vpop.permute.xlu1 %618 }
  0xea   :  { %804 = vmatmul.mubr.f32.gmra.mrb[4].mxu0 %v278_v6  ;;  %816 = vmatmul.mubr.f32.gmra.mrb[4].mxu1 %v286_v7 }
  0xeb   :  { %806 = vmatprep.mubr.f32.mxu0 %v279_v8  ;;  %818 = vmatprep.mubr.f32.mxu1 %v287_v9 }
  0xee   :  { %807 = vmatmul.mubr.f32.gmra.mrb[6].mxu0 %v280_v10  ;;  %819 = vmatmul.mubr.f32.gmra.mrb[6].mxu1 %v288_v11  ;;  %v524_v18 = vpop.permute.xlu1 %523 }
  0xf2   :  { %v529_v20 = vpop.permute.xlu1 %528 }
  0xf6   :  { %v534_v22 = vpop.permute.xlu1 %533 }
  0xfa   :  { %v539_v24 = vpop.permute.xlu1 %538 }
  0xfe   :  { %v544_v26 = vpop.permute.xlu1 %543 }
 0x102   :  { %v549_v28 = vpop.permute.xlu1 %548 }
 0x106   :  { %v554_v2 = vpop.permute.xlu1 %553 }
 0x10a   :  { %v559_v31 = vpop.permute.xlu1 %558 }
 0x10e   :  { %v564_v50 = vpop.permute.xlu1 %563 }
 0x112   :  { %v569_v11 = vpop.permute.xlu1 %568 }
 0x1b5   :  { %v799_v32 = vpop.f32.mrb[0].mxu0  ;;  %v811_v34 = vpop.f32.mrb[0].mxu1 }
 0x1b6   :  { %v582_v35 = vadd.f32 %v799_v32, %v509_v15  ;;  %v355_v37 = vpop.f32.mrb[1].mxu0  ;;  %v395_v38 = vpop.f32.mrb[1].mxu1 }
 0x1b7   :  { %v581_v39 = vadd.f32 %v504_v12, %v355_v37  ;;  %v589_v7 = vadd.f32 %v544_v26, %v395_v38  ;;  %v590_v12 = vadd.f32 %v811_v34, %v549_v28 }
 0x1b8   :  { %v598_v41 = vmax.f32 %v582_v35, 0.0 }
 0x1b9   :  { %v597_v42 = vmax.f32 %v581_v39, 0.0  ;;  %v802_v43 = vpop.f32.mrb[2].mxu0  ;;  %v814_v44 = vpop.f32.mrb[2].mxu1  ;;  %v606_v32 = vmax.f32 %v590_v12, 0.0 }
 0x1ba   :  { %v678_v45 = vmul.f32 %v619_v16, %v598_v41  ;;  %v584_v46 = vadd.f32 %v802_v43, %v519_v14  ;;  %v365_v33 = vpop.f32.mrb[3].mxu0  ;;  %v405_v47 = vpop.f32.mrb[3].mxu1  ;;  %v592_v35 = vadd.f32 %v814_v44, %v559_v31 }
 0x1bb   :  { %v677_v48 = vmul.f32 %v615_v17, %v597_v42  ;;  %v583_v49 = vadd.f32 %v514_v13, %v365_v33  ;;  %v659_v17 = vpop.permute.xlu0 %658  ;;  %v574_v39 = vpop.permute.xlu1 %573  ;;  %v686_v28 = vmul.f32 %v651_v40, %v606_v32 }
 0x1bc   :  { %v600_v52 = vmax.f32 %v584_v46, 0.0 }
 0x1bd   :  { %v693_v51 = vadd.f32 %v678_v45, %v677_v48  ;;  %v599_v53 = vmax.f32 %v583_v49, 0.0  ;;  %v805_v54 = vpop.f32.mrb[4].mxu0  ;;  %v817_v55 = vpop.f32.mrb[4].mxu1 }
 0x1be   :  { %v586_v56 = vadd.f32 %v805_v54, %v529_v20  ;;  %v375_v57 = vpop.f32.mrb[5].mxu0  ;;  %v415_v58 = vpop.f32.mrb[5].mxu1  ;;  %v680_v62 = vmul.f32 %v627_v21, %v600_v52  ;;  %v594_v34 = vadd.f32 %v817_v55, %v569_v11 }
 0x1bf   :  { %v679_v59 = vmul.f32 %v623_v19, %v599_v53  ;;  %v585_v60 = vadd.f32 %v524_v18, %v375_v57  ;;  %v605_v18 = vmax.f32 %v589_v7, 0.0  ;;  %v591_v19 = vadd.f32 %v554_v2, %v405_v47  ;;  %v663_v41 = vpop.permute.xlu0 %662 }
 0x1c0   :  { %v602_v36 = vmax.f32 %v586_v56, 0.0  ;;  %v593_v38 = vadd.f32 %v564_v50, %v415_v58  ;;  %v610_v47 = vmax.f32 %v594_v34, 0.0 }
 0x1c1   :  { %v694_v63 = vadd.f32 %v693_v51, %v679_v59  ;;  %v601_v0 = vmax.f32 %v585_v60, 0.0  ;;  %v808_v1 = vpop.f32.mrb[6].mxu0  ;;  %v820_v3 = vpop.f32.mrb[6].mxu1  ;;  %v685_v26 = vmul.f32 %v647_v30, %v605_v18 }
 0x1c2   :  { %v588_v4 = vadd.f32 %v808_v1, %v539_v24  ;;  %v385_v5 = vpop.f32.mrb[7].mxu0  ;;  %v425_v6 = vpop.f32.mrb[7].mxu1  ;;  %v682_v13 = vmul.f32 %v635_v25, %v602_v36  ;;  %v608_v25 = vmax.f32 %v592_v35, 0.0  ;;  %v609_v45 = vmax.f32 %v593_v38, 0.0 }
 0x1c3   :  { %v681_v8 = vmul.f32 %v631_v23, %v601_v0  ;;  %v695_v9 = vadd.f32 %v694_v63, %v680_v62  ;;  %v587_v10 = vadd.f32 %v534_v22, %v385_v5  ;;  %v607_v23 = vmax.f32 %v591_v19, 0.0  ;;  %v667_v44 = vpop.permute.xlu0 %666 }
 0x1c4   :  { %v604_v15 = vmax.f32 %v588_v4, 0.0  ;;  %v595_v2 = vadd.f32 %v574_v39, %v425_v6  ;;  %v688_v33 = vmul.f32 %v659_v17, %v608_v25  ;;  %v689_v48 = vmul.f32 %v663_v41, %v609_v45 }
 0x1c5   :  { %v696_v14 = vadd.f32 %v695_v9, %v681_v8  ;;  %v603_v16 = vmax.f32 %v587_v10, 0.0  ;;  %v687_v43 = vmul.f32 %v655_v61, %v607_v23  ;;  %v690_v51 = vmul.f32 %v667_v44, %v610_v47 }
 0x1c6   :  { %v684_v24 = vmul.f32 %v643_v29, %v604_v15  ;;  %v611_v30 = vmax.f32 %v595_v2, 0.0  ;;  %v715_v36 = vstv %s1167_s4 }
 0x1c7   :  { %v683_v20 = vmul.f32 %v639_v27, %v603_v16  ;;  %v697_v21 = vadd.f32 %v696_v14, %v682_v13  ;;  %v579_v27 = vpop.permute.xlu1 %578  ;;  %v675_v55 = vpop.permute.xlu0 %674 }
 0x1c8   :  { %v596_v31 = vadd.f32 %v820_v3, %v579_v27 }
 0x1c9   :  { %v698_v37 = vadd.f32 %v697_v21, %v683_v20 }
 0x1ca   :  { %v612_v52 = vmax.f32 %v596_v31, 0.0 }
 0x1cb   :  { %v699_v22 = vadd.f32 %v698_v37, %v684_v24  ;;  %v671_v50 = vpop.permute.xlu1 %670 }
 0x1cc   :  { %v691_v53 = vmul.f32 %v671_v50, %v611_v30  ;;  %v692_v56 = vmul.f32 %v675_v55, %v612_v52 }
 0x1cd   :  { %v700_v42 = vadd.f32 %v699_v22, %v685_v26 }
 0x1cf   :  { %v701_v46 = vadd.f32 %v700_v42, %v686_v28 }
 0x1d1   :  { %v702_v29 = vadd.f32 %v701_v46, %v687_v43 }
 0x1d3   :  { %v703_v49 = vadd.f32 %v702_v29, %v688_v33 }
 0x1d5   :  { %v704_v40 = vadd.f32 %v703_v49, %v689_v48 }
 0x1d7   :  { %v705_v54 = vadd.f32 %v704_v40, %v690_v51 }
 0x1d9   :  { %v706_v57 = vadd.f32 %v705_v54, %v691_v53 }
 0x1db   :  { %v707_v58 = vadd.f32 %v706_v57, %v692_v56 }
 0x1dd   :  { %v708_v59 = vrot.slane %v707_v58, 4 }
 0x1df   :  { %v709_v60 = vadd.f32 %v708_v59, %v707_v58 }
 0x1e1   :  { %v710_v61 = vrot.slane %v709_v60, 2 }
 0x1e3   :  { %v711_v62 = vadd.f32 %v710_v61, %v709_v60 }
 0x1e5   :  { %v712_v63 = vrot.slane %v711_v62, 1 }
 0x1e7   :  { %v713_v0 = vadd.f32 %v712_v63, %v711_v62 }
 0x1e9   :  { %v716_v1 = vadd.f32 %v715_v36, %v713_v0 }
 0x1eb   :  { %717 = vst [vmem:[#allocation4] sm:$0x1] %v716_v1 }
 0x1ec   :  { %907 = shalt.err (!%p904_p4)
}
 0x1ed   :  { %s908_s16 = scalar_lea.hbm %s1168_s5, 16 }
 0x1ee   :  { %p909_p5 = scmp.ne.s32.totalorder %s1168_s5, %s908_s16  ;;  %p912_p6 = scmp.lt.u32.totalorder %s908_s16, %s1168_s5 }
 0x1f0   :  { %p914_p7 = pnand %p912_p6, %p909_p5 }
 0x1f2   :  { %917 = shalt.err (!%p914_p7)
}
 0x1f3   :  { %727 = dma.vmem_to_hbm [thread:$0]  %s725_s11, 16, %s1168_s5, [#allocation5]  }
 0x1f4   :  { %918 = dma.done.wait [#allocation5], 16  }
 0x1f5   :  { %919 = vsyncadd [#allocation5], 4294967280 }
 0x1f6   :  { %731 = vsyncpa [#allocation5], 1 }

</bundles_post_ra>
